<compile_context>
chip_gen: v6e
topology: v6e:2x2x1
jax: 0.10.0
libtpu: 0.0.40
codegen_flags: <defaults>
</compile_context>

<pallas_src>
import functools

import jax
import jax.numpy as jnp
from jax import lax
from jax.experimental import pallas as pl
from jax.experimental.pallas import tpu as pltpu


def _self_attention_kernel(xq_ref, xkT_ref, xkv_ref, xres_ref,
                           mqk_ref, mb_ref, wv_ref, bv_ref,
                           out_ref,
                           m_scr, l_scr, acc_scr, qm_scr,
                           *, bf16_exp):
    ki = pl.program_id(2)

    @pl.when(ki == 0)
    def _init():
        m_scr[...] = jnp.full(m_scr.shape, -jnp.inf, dtype=m_scr.dtype)
        l_scr[...] = jnp.zeros(l_scr.shape, dtype=l_scr.dtype)
        acc_scr[...] = jnp.zeros(acc_scr.shape, dtype=acc_scr.dtype)
        # qm = (Wq x_q + bq)^T Wk for this query tile — computed once per (b, qi).
        qm = jnp.dot(xq_ref[0], mqk_ref[...], preferred_element_type=jnp.float32)
        qm_scr[...] = (qm + mb_ref[...].astype(jnp.float32)).astype(jnp.bfloat16)

    # Energy tile (tq, tk): standard (M,K)x(K,N) matmul with a lane-dense RHS.
    s = jnp.dot(qm_scr[...], xkT_ref[0], preferred_element_type=jnp.float32)

    # Online softmax (running statistics stay in f32).
    m_prev = m_scr[...]
    m_new = jnp.maximum(m_prev, jnp.max(s, axis=-1, keepdims=True))
    alpha = jnp.exp(m_prev - m_new)
    if bf16_exp:
        # v6e / v7x: packed-bf16 EUP doubles exp throughput; the cast-up for the
        # row sum runs on the (slack) VPU.
        p = jnp.exp((s - m_new).astype(jnp.bfloat16))
        p_sum = jnp.sum(p.astype(jnp.float32), axis=-1, keepdims=True)
    else:
        # v5e has no bf16 EUP: keep exp / sum in f32.
        p_f32 = jnp.exp(s - m_new)
        p = p_f32.astype(jnp.bfloat16)
        p_sum = jnp.sum(p_f32, axis=-1, keepdims=True)

    l_scr[...] = alpha * l_scr[...] + p_sum
    # Accumulate the attention-weighted *input*; the value projection (Wv, bv)
    # is deferred to the finalize since attention rows sum to 1.
    acc_scr[...] = alpha * acc_scr[...] + jnp.dot(
        p, xkv_ref[0], preferred_element_type=jnp.float32)
    m_scr[...] = m_new

    @pl.when(ki == pl.num_programs(2) - 1)
    def _finalize():
        attn_out = acc_scr[...] / l_scr[...]                       # (tq, C) f32
        # out (C, tq) = (gamma*Wv) @ attn_out^T + gamma*bv + x — once per q tile,
        # producing a lane-dense (tq-wide) store.
        out_cq = lax.dot_general(
            wv_ref[...], attn_out,
            dimension_numbers=(((1,), (1,)), ((), ())),
            preferred_element_type=jnp.float32)
        out_ref[0] = (out_cq + bv_ref[...] + xres_ref[0]).astype(out_ref.dtype)


def _pick_tile(n, cap):
    """Largest multiple-of-128 divisor of n that is <= cap (lane-dense tiles).

    Falls back to n (full extent — always a legal block) when no such divisor
    exists (n < 128 or n not a multiple of 128)."""
    best = None
    t = 128
    while t <= min(n, cap):
        if n % t == 0:
            best = t
        t += 128
    return best if best is not None else n


def _has_bf16_eup():
    """True on TPU generations with a bf16 EUP/VPU (v6e, v7x, ...)."""
    try:
        kind = jax.devices()[0].device_kind.lower()
    except Exception:
        return False
    if ("tpu" not in kind) and ("v6" not in kind) and ("v7" not in kind):
        return False
    return not any(tag in kind for tag in ("v2", "v3", "v4", "v5"))


def self_attention_pallas(x, params, *, tq_cap=512, tk_cap=1024,
                          kv_buffers=2, bf16_exp=None):
    """x: (B, C, W, H) float32.  Returns out: (B, C, W, H) float32."""
    B, C, W, H = x.shape
    N = W * H
    if bf16_exp is None:
        bf16_exp = _has_bf16_eup()

    # (B, C, N) is a free reshape of NCHW — residual (f32) and energy-side kv (bf16).
    x_cn = x.reshape(B, C, N).astype(jnp.float32)
    x_cn_bf16 = x_cn.astype(jnp.bfloat16)
    # (B, N, C) needs one transpose pass — query tiles and value-side kv (bf16).
    x_nc_bf16 = jnp.transpose(x_cn, (0, 2, 1)).astype(jnp.bfloat16)

    wq, bq = params["wq"], params["bq"]          # (C//8, C), (C//8,)
    wk = params["wk"]                            # params["bk"] cancels in the row softmax
    wv, bv = params["wv"], params["bv"]          # (C, C), (C,)
    gamma = params["gamma"][0]

    # Fused Q/K bilinear form: energy[i,j] = (x_i^T Wq^T + bq^T) Wk x_j + const_i;
    # the per-row constants drop out of the softmax.
    mqk = (wq.T @ wk).astype(jnp.bfloat16)                   # (C, C)
    mb = (bq @ wk).reshape(1, C).astype(jnp.bfloat16)        # (1, C)
    # Attention rows sum to 1 -> Wv / bv applied once at finalize; fold gamma into
    # these tiny constants so the epilogue is a single matmul + add + residual.
    wv_g = (gamma * wv).astype(jnp.float32)                  # (C, C)
    bv_g = (gamma * bv).reshape(C, 1).astype(jnp.float32)    # (C, 1)

    tq = _pick_tile(N, tq_cap)
    tk = _pick_tile(N, tk_cap)
    nq, nk = N // tq, N // tk

    # VMEM budget from actual tile bytes (2x safety, floor 32 MiB, cap 48 MiB).
    nbuf = max(2, kv_buffers)
    est = (2 * tq * C * 2                                    # query tile (bf16)
           + nbuf * C * tk * 2                               # energy-side kv tile (bf16)
           + nbuf * tk * C * 2                               # value-side kv tile (bf16)
           + 2 * C * tq * 4                                  # residual tile (f32)
           + 2 * C * tq * 4                                  # output tile (f32)
           + 2 * (C * C * 2 + C * 2 + C * C * 4 + C * 4)     # resident weights
           + 2 * tq * 4 * 2 + tq * C * 4 + tq * C * 2        # scratch m, l, acc, qm
           + 3 * tq * tk * 4)                                # energy / p intermediates
    vmem_limit = int(min(max(2 * est, 32 * 1024 * 1024), 48 * 1024 * 1024))

    kv_kwargs = {}
    if kv_buffers != 2:
        # Optional deeper kv pipelining (cheap) if profiling shows exposed kv DMA.
        kv_kwargs["pipeline_mode"] = pl.Buffered(kv_buffers)

    grid_spec = pltpu.PrefetchScalarGridSpec(
        num_scalar_prefetch=0,
        grid=(B, nq, nk),
        in_specs=[
            pl.BlockSpec((1, tq, C), lambda b, qi, ki: (b, qi, 0)),   # x (N,C): query tile
            pl.BlockSpec((1, C, tk), lambda b, qi, ki: (b, 0, ki),    # x (C,N): energy kv tile
                         **kv_kwargs),
            pl.BlockSpec((1, tk, C), lambda b, qi, ki: (b, ki, 0),    # x (N,C): value kv tile
                         **kv_kwargs),
            pl.BlockSpec((1, C, tq), lambda b, qi, ki: (b, 0, qi)),   # residual (f32)
            pl.BlockSpec((C, C),     lambda b, qi, ki: (0, 0)),       # Wq^T Wk
            pl.BlockSpec((1, C),     lambda b, qi, ki: (0, 0)),       # bq^T Wk
            pl.BlockSpec((C, C),     lambda b, qi, ki: (0, 0)),       # gamma * Wv
            pl.BlockSpec((C, 1),     lambda b, qi, ki: (0, 0)),       # gamma * bv
        ],
        out_specs=pl.BlockSpec((1, C, tq), lambda b, qi, ki: (b, 0, qi)),
        scratch_shapes=[
            pltpu.VMEM((tq, 1), jnp.float32),       # running max
            pltpu.VMEM((tq, 1), jnp.float32),       # running denominator
            pltpu.VMEM((tq, C), jnp.float32),       # attention-weighted-x accumulator
            pltpu.VMEM((tq, C), jnp.bfloat16),      # qm = (Wq x_q + bq)^T Wk
        ],
    )

    kernel = functools.partial(_self_attention_kernel, bf16_exp=bf16_exp)

    out_cn = pl.pallas_call(
        kernel,
        out_shape=jax.ShapeDtypeStruct((B, C, N), jnp.float32),
        grid_spec=grid_spec,
        compiler_params=pltpu.CompilerParams(
            # (batch, q-tile) shard across v7x's two TensorCores; kv reduction is
            # innermost + arbitrary.
            # TODO(synk): if a v7x profile ever shows one idle core, switch the
            # leading axis to pltpu.CORE_PARALLEL.
            dimension_semantics=("parallel", "parallel", "arbitrary"),
            vmem_limit_bytes=vmem_limit,
        ),
    )(x_nc_bf16, x_cn_bf16, x_nc_bf16, x_cn, mqk, mb, wv_g, bv_g)

    # Lane-dense (B, C, N) output -> plain reshape back to NCHW (no transpose).
    return out_cn.reshape(B, C, W, H)


def _reference(x, params):
    """Pure-JAX f32 reference mirroring the PyTorch forward."""
    B, C, W, H = x.shape
    N = W * H
    x2 = x.reshape(B, C, N)
    q = jnp.einsum("oc,bcn->bon", params["wq"], x2) + params["bq"][None, :, None]
    k = jnp.einsum("oc,bcn->bon", params["wk"], x2) + params["bk"][None, :, None]
    v = jnp.einsum("oc,bcn->bon", params["wv"], x2) + params["bv"][None, :, None]
    proj_query = jnp.transpose(q, (0, 2, 1))
    energy = jnp.einsum("bik,bkj->bij", proj_query, k)
    attn = jax.nn.softmax(energy, axis=-1)
    out = jnp.einsum("bcn,bin->bci", v, attn).reshape(B, C, W, H)
    return params["gamma"][0] * out + x


if __name__ == "__main__":
    # in_dim=16 -> query/key channels = 2; N = 16*16 = 256.
    B, C, W, H = 2, 16, 16, 16
    key = jax.random.PRNGKey(0)
    kx, k1, k2, k3, k4, k5, k6 = jax.random.split(key, 7)

    x = jax.random.normal(kx, (B, C, W, H), dtype=jnp.float32)

    C8 = C // 8
    params = {
        # Conv2d(kernel_size=1) weights (out, in, 1, 1) stored as (out, in).
        "wq": jax.random.normal(k1, (C8, C), dtype=jnp.float32) * 0.1,
        "bq": jax.random.normal(k2, (C8,), dtype=jnp.float32) * 0.1,
        "wk": jax.random.normal(k3, (C8, C), dtype=jnp.float32) * 0.1,
        "bk": jax.random.normal(k4, (C8,), dtype=jnp.float32) * 0.1,
        "wv": jax.random.normal(k5, (C, C), dtype=jnp.float32) * 0.1,
        "bv": jax.random.normal(k6, (C,), dtype=jnp.float32) * 0.1,
        # nn.Parameter(torch.zeros(1)); nonzero so the attention path matters.
        "gamma": jnp.array([0.5], dtype=jnp.float32),
    }

    # Small tile caps so the test exercises multi-tile query AND kv loops
    # (grid = (2, 2, 2)); production defaults use bigger tiles.
    out = self_attention_pallas(x, params, tq_cap=128, tk_cap=128)
    out = jax.block_until_ready(out)

    ref = _reference(x, params)
    assert out.shape == (B, C, W, H)
    max_err = float(jnp.max(jnp.abs(out - ref)))
    # bf16 MXU operands (and bf16 exp on v6e/v7x) -> loosened tolerance vs f32 ref.
    assert jnp.allclose(out, ref, atol=2e-2, rtol=2e-2), (
        f"mismatch vs reference (max_err={max_err})")

    print("KERNEL_OK")
</pallas_src>

<mosaic_0001>
module attributes {stable_mosaic.version = 11 : i64} {
  func.func @_self_attention_kernel(%arg0: i32, %arg1: i32, %arg2: i32, %arg3: memref<1x128x16xbf16, #tpu.memory_space<vmem>>, %arg4: memref<1x16x128xbf16, #tpu.memory_space<vmem>>, %arg5: memref<1x128x16xbf16, #tpu.memory_space<vmem>>, %arg6: memref<1x16x128xf32, #tpu.memory_space<vmem>>, %arg7: memref<16x16xbf16, #tpu.memory_space<vmem>>, %arg8: memref<1x16xbf16, #tpu.memory_space<vmem>>, %arg9: memref<16x16xf32, #tpu.memory_space<vmem>>, %arg10: memref<16x1xf32, #tpu.memory_space<vmem>>, %arg11: memref<1x16x128xf32, #tpu.memory_space<vmem>>, %arg12: memref<128x1xf32, #tpu.memory_space<vmem>>, %arg13: memref<128x1xf32, #tpu.memory_space<vmem>>, %arg14: memref<128x16xf32, #tpu.memory_space<vmem>>, %arg15: memref<128x16xbf16, #tpu.memory_space<vmem>>) attributes {dimension_semantics = [#tpu.dimension_semantics<parallel>, #tpu.dimension_semantics<parallel>, #tpu.dimension_semantics<arbitrary>], iteration_bounds = array<i64: 2, 2, 2>, scalar_prefetch = 0 : i64, scratch_operands = 4 : i64, tpu.core_type = #tpu.core_type<tc>, window_params = [{transform_indices = @transform_0, window_bounds = array<i64: 1, 128, 16>}, {transform_indices = @transform_1, window_bounds = array<i64: 1, 16, 128>}, {transform_indices = @transform_2, window_bounds = array<i64: 1, 128, 16>}, {transform_indices = @transform_3, window_bounds = array<i64: 1, 16, 128>}, {pipeline_mode = #tpu.pipeline_mode<synchronous>, transform_indices = @transform_4, window_bounds = array<i64: 16, 16>}, {pipeline_mode = #tpu.pipeline_mode<synchronous>, transform_indices = @transform_5, window_bounds = array<i64: 1, 16>}, {pipeline_mode = #tpu.pipeline_mode<synchronous>, transform_indices = @transform_6, window_bounds = array<i64: 16, 16>}, {pipeline_mode = #tpu.pipeline_mode<synchronous>, transform_indices = @transform_7, window_bounds = array<i64: 16, 1>}, {transform_indices = @transform_8, window_bounds = array<i64: 1, 16, 128>}]} {
    %c0_i32 = arith.constant 0 : i32
    %0 = arith.cmpi eq, %arg2, %c0_i32 : i32
    %1 = arith.extui %0 : i1 to i32
    %c0_i32_0 = arith.constant 0 : i32
    %2 = arith.cmpi ne, %1, %c0_i32_0 : i32
    scf.if %2 {
      %cst_24 = arith.constant 0xFF800000 : f32
      %35 = vector.broadcast %cst_24 : f32 to vector<128x1xf32>
      %c0_25 = arith.constant 0 : index
      %c0_26 = arith.constant 0 : index
      %36 = vector.load %arg12[%c0_25, %c0_26] : memref<128x1xf32, #tpu.memory_space<vmem>>, vector<128x1xf32>
      tpu.vector_store %arg12[%c0_25, %c0_26], %35 {strides = array<i32>} : memref<128x1xf32, #tpu.memory_space<vmem>>, vector<128x1xf32>,
      %cst_27 = arith.constant 0.000000e+00 : f32
      %37 = vector.broadcast %cst_27 : f32 to vector<128x1xf32>
      %c0_28 = arith.constant 0 : index
      %c0_29 = arith.constant 0 : index
      %38 = vector.load %arg13[%c0_28, %c0_29] : memref<128x1xf32, #tpu.memory_space<vmem>>, vector<128x1xf32>
      tpu.vector_store %arg13[%c0_28, %c0_29], %37 {strides = array<i32>} : memref<128x1xf32, #tpu.memory_space<vmem>>, vector<128x1xf32>,
      %cst_30 = arith.constant 0.000000e+00 : f32
      %39 = vector.broadcast %cst_30 : f32 to vector<128x16xf32>
      %c0_31 = arith.constant 0 : index
      %c0_32 = arith.constant 0 : index
      %40 = vector.load %arg14[%c0_31, %c0_32] : memref<128x16xf32, #tpu.memory_space<vmem>>, vector<128x16xf32>
      tpu.vector_store %arg14[%c0_31, %c0_32], %39 {strides = array<i32>} : memref<128x16xf32, #tpu.memory_space<vmem>>, vector<128x16xf32>,
      %c0_33 = arith.constant 0 : index
      %c0_34 = arith.constant 0 : index
      %c0_35 = arith.constant 0 : index
      %41 = vector.load %arg3[%c0_33, %c0_34, %c0_35] : memref<1x128x16xbf16, #tpu.memory_space<vmem>>, vector<1x128x16xbf16>
      %42 = vector.shape_cast %41 : vector<1x128x16xbf16> to vector<128x16xbf16>
      %c0_36 = arith.constant 0 : index
      %c0_37 = arith.constant 0 : index
      %43 = vector.load %arg7[%c0_36, %c0_37] : memref<16x16xbf16, #tpu.memory_space<vmem>>, vector<16x16xbf16>
      %cst_38 = arith.constant dense<0.000000e+00> : vector<128x16xf32>
      %44 = tpu.matmul %42, %43, %cst_38 {dimension_numbers = #tpu.dot_dimension_numbers<[1], [0], [0], [1], [0, 0, 1, 1], [], []>} : vector<128x16xbf16>, vector<16x16xbf16>, vector<128x16xf32> -> vector<128x16xf32>
      %c0_39 = arith.constant 0 : index
      %c0_40 = arith.constant 0 : index
      %45 = vector.load %arg8[%c0_39, %c0_40] : memref<1x16xbf16, #tpu.memory_space<vmem>>, vector<1x16xbf16>
      %46 = arith.extf %45 : vector<1x16xbf16> to vector<1x16xf32>
      %47 = vector.broadcast %46 : vector<1x16xf32> to vector<128x16xf32>
      %48 = arith.addf %44, %47 : vector<128x16xf32>
      %49 = arith.truncf %48 : vector<128x16xf32> to vector<128x16xbf16>
      %c0_41 = arith.constant 0 : index
      %c0_42 = arith.constant 0 : index
      %50 = vector.load %arg15[%c0_41, %c0_42] : memref<128x16xbf16, #tpu.memory_space<vmem>>, vector<128x16xbf16>
      tpu.vector_store %arg15[%c0_41, %c0_42], %49 {strides = array<i32>} : memref<128x16xbf16, #tpu.memory_space<vmem>>, vector<128x16xbf16>,
    } else {
    }
    %c0 = arith.constant 0 : index
    %c0_1 = arith.constant 0 : index
    %3 = vector.load %arg15[%c0, %c0_1] : memref<128x16xbf16, #tpu.memory_space<vmem>>, vector<128x16xbf16>
    %c0_2 = arith.constant 0 : index
    %c0_3 = arith.constant 0 : index
    %c0_4 = arith.constant 0 : index
    %4 = vector.load %arg4[%c0_2, %c0_3, %c0_4] : memref<1x16x128xbf16, #tpu.memory_space<vmem>>, vector<1x16x128xbf16>
    %5 = vector.shape_cast %4 : vector<1x16x128xbf16> to vector<16x128xbf16>
    %cst = arith.constant dense<0.000000e+00> : vector<128x128xf32>
    %6 = tpu.matmul %3, %5, %cst {dimension_numbers = #tpu.dot_dimension_numbers<[1], [0], [0], [1], [0, 0, 1, 1], [], []>} : vector<128x16xbf16>, vector<16x128xbf16>, vector<128x128xf32> -> vector<128x128xf32>
    %c0_5 = arith.constant 0 : index
    %c0_6 = arith.constant 0 : index
    %7 = vector.load %arg12[%c0_5, %c0_6] : memref<128x1xf32, #tpu.memory_space<vmem>>, vector<128x1xf32>
    %cst_7 = arith.constant dense<0xFF800000> : vector<128xf32>
    %8 = vector.multi_reduction <maximumf>, %6, %cst_7 [1] : vector<128x128xf32> to vector<128xf32>
    %9 = vector.shape_cast %8 : vector<128xf32> to vector<128x1xf32>
    %10 = arith.maximumf %7, %9 : vector<128x1xf32>
    %11 = arith.subf %7, %10 : vector<128x1xf32>
    %12 = math.exp %11 : vector<128x1xf32>
    %13 = vector.broadcast %10 : vector<128x1xf32> to vector<128x128xf32>
    %14 = arith.subf %6, %13 : vector<128x128xf32>
    %15 = math.exp %14 : vector<128x128xf32>
    %16 = arith.truncf %15 : vector<128x128xf32> to vector<128x128xbf16>
    %cst_8 = arith.constant dense<0.000000e+00> : vector<128xf32>
    %17 = vector.multi_reduction <add>, %15, %cst_8 [1] : vector<128x128xf32> to vector<128xf32>
    %18 = vector.shape_cast %17 : vector<128xf32> to vector<128x1xf32>
    %c0_9 = arith.constant 0 : index
    %c0_10 = arith.constant 0 : index
    %19 = vector.load %arg13[%c0_9, %c0_10] : memref<128x1xf32, #tpu.memory_space<vmem>>, vector<128x1xf32>
    %20 = arith.mulf %12, %19 : vector<128x1xf32>
    %21 = arith.addf %20, %18 : vector<128x1xf32>
    %c0_11 = arith.constant 0 : index
    %c0_12 = arith.constant 0 : index
    %22 = vector.load %arg13[%c0_11, %c0_12] : memref<128x1xf32, #tpu.memory_space<vmem>>, vector<128x1xf32>
    tpu.vector_store %arg13[%c0_11, %c0_12], %21 {strides = array<i32>} : memref<128x1xf32, #tpu.memory_space<vmem>>, vector<128x1xf32>,
    %c0_13 = arith.constant 0 : index
    %c0_14 = arith.constant 0 : index
    %23 = vector.load %arg14[%c0_13, %c0_14] : memref<128x16xf32, #tpu.memory_space<vmem>>, vector<128x16xf32>
    %24 = vector.broadcast %12 : vector<128x1xf32> to vector<128x16xf32>
    %25 = arith.mulf %24, %23 : vector<128x16xf32>
    %c0_15 = arith.constant 0 : index
    %c0_16 = arith.constant 0 : index
    %c0_17 = arith.constant 0 : index
    %26 = vector.load %arg5[%c0_15, %c0_16, %c0_17] : memref<1x128x16xbf16, #tpu.memory_space<vmem>>, vector<1x128x16xbf16>
    %27 = vector.shape_cast %26 : vector<1x128x16xbf16> to vector<128x16xbf16>
    %cst_18 = arith.constant dense<0.000000e+00> : vector<128x16xf32>
    %28 = tpu.matmul %16, %27, %cst_18 {dimension_numbers = #tpu.dot_dimension_numbers<[1], [0], [0], [1], [0, 0, 1, 1], [], []>} : vector<128x128xbf16>, vector<128x16xbf16>, vector<128x16xf32> -> vector<128x16xf32>
    %29 = arith.addf %25, %28 : vector<128x16xf32>
    %c0_19 = arith.constant 0 : index
    %c0_20 = arith.constant 0 : index
    %30 = vector.load %arg14[%c0_19, %c0_20] : memref<128x16xf32, #tpu.memory_space<vmem>>, vector<128x16xf32>
    tpu.vector_store %arg14[%c0_19, %c0_20], %29 {strides = array<i32>} : memref<128x16xf32, #tpu.memory_space<vmem>>, vector<128x16xf32>,
    %c0_21 = arith.constant 0 : index
    %c0_22 = arith.constant 0 : index
    %31 = vector.load %arg12[%c0_21, %c0_22] : memref<128x1xf32, #tpu.memory_space<vmem>>, vector<128x1xf32>
    tpu.vector_store %arg12[%c0_21, %c0_22], %10 {strides = array<i32>} : memref<128x1xf32, #tpu.memory_space<vmem>>, vector<128x1xf32>,
    %c1_i32 = arith.constant 1 : i32
    %32 = arith.cmpi eq, %arg2, %c1_i32 : i32
    %33 = arith.extui %32 : i1 to i32
    %c0_i32_23 = arith.constant 0 : i32
    %34 = arith.cmpi ne, %33, %c0_i32_23 : i32
    scf.if %34 {
      %c0_24 = arith.constant 0 : index
      %c0_25 = arith.constant 0 : index
      %35 = vector.load %arg14[%c0_24, %c0_25] : memref<128x16xf32, #tpu.memory_space<vmem>>, vector<128x16xf32>
      %c0_26 = arith.constant 0 : index
      %c0_27 = arith.constant 0 : index
      %36 = vector.load %arg13[%c0_26, %c0_27] : memref<128x1xf32, #tpu.memory_space<vmem>>, vector<128x1xf32>
      %37 = vector.broadcast %36 : vector<128x1xf32> to vector<128x16xf32>
      %38 = arith.divf %35, %37 : vector<128x16xf32>
      %c0_28 = arith.constant 0 : index
      %c0_29 = arith.constant 0 : index
      %39 = vector.load %arg9[%c0_28, %c0_29] : memref<16x16xf32, #tpu.memory_space<vmem>>, vector<16x16xf32>
      %cst_30 = arith.constant dense<0.000000e+00> : vector<16x128xf32>
      %40 = tpu.matmul %39, %38, %cst_30 {dimension_numbers = #tpu.dot_dimension_numbers<[1], [1], [0], [0], [0, 0, 1, 0], [], []>} : vector<16x16xf32>, vector<128x16xf32>, vector<16x128xf32> -> vector<16x128xf32>
      %c0_31 = arith.constant 0 : index
      %c0_32 = arith.constant 0 : index
      %41 = vector.load %arg10[%c0_31, %c0_32] : memref<16x1xf32, #tpu.memory_space<vmem>>, vector<16x1xf32>
      %42 = vector.broadcast %41 : vector<16x1xf32> to vector<16x128xf32>
      %43 = arith.addf %40, %42 : vector<16x128xf32>
      %c0_33 = arith.constant 0 : index
      %c0_34 = arith.constant 0 : index
      %c0_35 = arith.constant 0 : index
      %44 = vector.load %arg6[%c0_33, %c0_34, %c0_35] : memref<1x16x128xf32, #tpu.memory_space<vmem>>, vector<1x16x128xf32>
      %45 = vector.shape_cast %44 : vector<1x16x128xf32> to vector<16x128xf32>
      %46 = arith.addf %43, %45 : vector<16x128xf32>
      %c0_36 = arith.constant 0 : index
      %c0_37 = arith.constant 0 : index
      %c0_38 = arith.constant 0 : index
      %47 = vector.load %arg11[%c0_36, %c0_37, %c0_38] : memref<1x16x128xf32, #tpu.memory_space<vmem>>, vector<1x16x128xf32>
      %48 = vector.shape_cast %47 : vector<1x16x128xf32> to vector<16x128xf32>
      %49 = vector.shape_cast %46 : vector<16x128xf32> to vector<1x16x128xf32>
      tpu.vector_store %arg11[%c0_36, %c0_37, %c0_38], %49 {strides = array<i32>} : memref<1x16x128xf32, #tpu.memory_space<vmem>>, vector<1x16x128xf32>,
    } else {
    }
    return
  }
  func.func @transform_0(%arg0: i32, %arg1: i32, %arg2: i32) -> (i32, i32, i32) {
    %c0_i32 = arith.constant 0 : i32
    %c0_i32_0 = arith.constant 0 : i32
    return %arg0, %arg1, %c0_i32 : i32, i32, i32
  }
  func.func @transform_1(%arg0: i32, %arg1: i32, %arg2: i32) -> (i32, i32, i32) {
    %c0_i32 = arith.constant 0 : i32
    %c0_i32_0 = arith.constant 0 : i32
    return %arg0, %c0_i32, %arg2 : i32, i32, i32
  }
  func.func @transform_2(%arg0: i32, %arg1: i32, %arg2: i32) -> (i32, i32, i32) {
    %c0_i32 = arith.constant 0 : i32
    %c0_i32_0 = arith.constant 0 : i32
    return %arg0, %arg2, %c0_i32 : i32, i32, i32
  }
  func.func @transform_3(%arg0: i32, %arg1: i32, %arg2: i32) -> (i32, i32, i32) {
    %c0_i32 = arith.constant 0 : i32
    %c0_i32_0 = arith.constant 0 : i32
    return %arg0, %c0_i32, %arg1 : i32, i32, i32
  }
  func.func @transform_4(%arg0: i32, %arg1: i32, %arg2: i32) -> (i32, i32) {
    %c0_i32 = arith.constant 0 : i32
    %c0_i32_0 = arith.constant 0 : i32
    %c0_i32_1 = arith.constant 0 : i32
    return %c0_i32, %c0_i32_0 : i32, i32
  }
  func.func @transform_5(%arg0: i32, %arg1: i32, %arg2: i32) -> (i32, i32) {
    %c0_i32 = arith.constant 0 : i32
    %c0_i32_0 = arith.constant 0 : i32
    %c0_i32_1 = arith.constant 0 : i32
    return %c0_i32, %c0_i32_0 : i32, i32
  }
  func.func @transform_6(%arg0: i32, %arg1: i32, %arg2: i32) -> (i32, i32) {
    %c0_i32 = arith.constant 0 : i32
    %c0_i32_0 = arith.constant 0 : i32
    %c0_i32_1 = arith.constant 0 : i32
    return %c0_i32, %c0_i32_0 : i32, i32
  }
  func.func @transform_7(%arg0: i32, %arg1: i32, %arg2: i32) -> (i32, i32) {
    %c0_i32 = arith.constant 0 : i32
    %c0_i32_0 = arith.constant 0 : i32
    %c0_i32_1 = arith.constant 0 : i32
    return %c0_i32, %c0_i32_0 : i32, i32
  }
  func.func @transform_8(%arg0: i32, %arg1: i32, %arg2: i32) -> (i32, i32, i32) {
    %c0_i32 = arith.constant 0 : i32
    %c0_i32_0 = arith.constant 0 : i32
    return %arg0, %c0_i32, %arg1 : i32, i32, i32
  }
}

</mosaic_0001>

<bundles_post_ra>
// kernel: tpu_custom_call.1
= control target key start
LH: loop header
LB: loop body
LE: loop exit
PB: predicated region body
PF: predicated region fallthrough
CT: control target
= control target key end

     0   :  { %s3597_s0 = inlined_call_operand.vmem [shape: bf16[2,256,16], index: 0, kind: input, shape index: {}]   ;;  %s3598_s1 = inlined_call_operand.vmem [shape: bf16[2,16,256], index: 1, kind: input, shape index: {}]   ;;  %s3599_s2 = inlined_call_operand.vmem [shape: bf16[2,256,16], index: 2, kind: input, shape index: {}]   ;;  %s3600_s3 = inlined_call_operand.vmem [shape: f32[2,16,256], index: 3, kind: input, shape index: {}]   ;;  %s3601_s4 = inlined_call_operand.vmem [shape: bf16[16,16], index: 4, kind: input, shape index: {}]   ;;  %s3602_s5 = inlined_call_operand.vmem [shape: bf16[1,16], index: 5, kind: input, shape index: {}]   ;;  %s3603_s6 = inlined_call_operand.vmem [shape: f32[16,16], index: 6, kind: input, shape index: {}]   ;;  %s3604_s7 = inlined_call_operand.vmem [shape: f32[16,1], index: 7, kind: input, shape index: {}]   ;;  %s3605_s8 = inlined_call_operand.hbm [shape: f32[2,16,256], index: 8, kind: output, shape index: {}]  }
   0x1   :  { %3618 = sst [smem:[#allocation20_spill]] %s3598_s1 }
   0x2   :  { %3619 = sst [smem:[#allocation21_spill]] %s3600_s3 }
   0x3   :  { %3620 = sst [smem:[#allocation22_spill]] %s3602_s5 }
   0x4   :  { %3621 = sst [smem:[#allocation23_spill]] %s3603_s6 }
   0x5   :  { %3622 = sst [smem:[#allocation24_spill]] %s3604_s7 }
   0x6   :  { %3623 = sst [smem:[#allocation25_spill]] %s3605_s8 }
   0x7   :  { %13 = vsyncpa [#allocation9], 0 }
   0x8   :  { %15 = vsyncpa [#allocation9 + $0x1], 0  ;;  %s2854_s27 = smov 0   ;;  %s2856_s28 = smov 0  }
   0x9   :  { %s2858_s29 = smov 0   ;;  %s2860_s30 = smov 0  }
   0xa   :  { %s2862_s9 = smov 0   ;;  %s2864_s10 = smov 0  }
   0xb   :  { %s2866_s11 = smov 0   ;;  %s2868_s12 = smov 0  }
   0xc   :  { %s2870_s13 = smov 0   ;;  %s2872_s14 = smov 0  }
   0xd   :  { %s2874_s15 = smov 0   ;;  %s2876_s16 = smov 0  }
   0xe LB: > { %3624 = sst [smem:[#allocation11_spill]] %s2755_s27  ;;  %s2147_s17 = sadd.s32 4294967295, %s2799_s16   ;;  %s2799_s16 = sphi %s2876_s16, %s21_s16   ;;  %s2795_s15 = sphi %s2874_s15, %s3654_s15   ;;  %s2791_s14 = sphi %s2872_s14, %s3653_s14   ;;  %s2787_s13 = sphi %s2870_s13, %s3652_s13   ;;  %s2783_s12 = sphi %s2868_s12, %s3651_s12   ;;  %s2779_s11 = sphi %s2866_s11, %s3650_s11   ;;  %s2775_s10 = sphi %s2864_s10, %s3649_s10   ;;  %s2771_s9 = sphi %s2862_s9, %s3659_s9   ;;  %s2767_s30 = sphi %s2860_s30, %s3658_s30   ;;  %s2763_s29 = sphi %s2858_s29, %s3657_s29   ;;  %s2759_s28 = sphi %s2856_s28, %s3656_s28   ;;  %s2755_s27 = sphi %s2854_s27, %s3655_s27  }
   0xf   : > { %3625 = sst [smem:[#allocation12_spill]] %s2787_s13  ;;  %s2148_s18 = sadd.s32 4294967294, %s2799_s16  }
  0x10   : > { %3626 = sst [smem:[#allocation13_spill]] %s2791_s14  ;;  %s33_s19 = sadd.s32 1, %s2787_s13 }
  0x11   : > { %3627 = sst [smem:[#allocation14_spill]] %s2795_s15  ;;  %p34_p0 = scmp.ge.s32.totalorder %s33_s19, 2 }
  0x12   : > { %s36_s20 = sadd.s32 1, %s2791_s14  ;;  %s40_s21 = sadd.s32 1, %s2795_s15 }
  0x13   : > { %p84_p1 = scmp.ne.s32.totalorder %s2771_s9, %s2767_s30  ;;  %s3661_s19 = smov (%p34_p0, %s33_s19), 0 }
  0x14   : > { %3628 = sst [smem:[#allocation15_spill]] %s3661_s19  ;;  %s3663_s20 = smov (!%p34_p0, %s36_s20), %s2791_s14 }
  0x15   : > { %s77_s22 = sadd.s32 1, %s2771_s9  ;;  %p85_p2 = scmp.eq.s32.totalorder %s2799_s16, 0 }
  0x16   : > { %p38_p3 = scmp.ge.s32.totalorder %s3663_s20, 2  ;;  %s73_s23 = ssub.s32 %s2787_s13, %s3661_s19 }
  0x17   : > { %p2928_p4 = por %p85_p2, %p84_p1  ;;  %p140_p5 = scmp.ne.s32.totalorder %s2763_s29, %s2759_s28 }
  0x18   : > { %s3665_s20 = smov (%p38_p3, %s3663_s20), 0  ;;  %s3667_s21 = smov (!%p38_p3, %s40_s21), %s2795_s15 }
  0x19   : > { %3630 = sst [smem:[#allocation16_spill]] %s3665_s20  ;;  %s129_s25 = ssub.s32 %s2791_s14, %s3665_s20 }
  0x1a   : > { %p2939_p6 = por %p140_p5, %p85_p2  ;;  %p42_p7 = scmp.ge.s32.totalorder %s3667_s21, 2 }
  0x1b   : > { %p256_p8 = scmp.eq.s32.totalorder %s2147_s17, 7  ;;  %p261_p9 = scmp.ne.s32.totalorder %s2759_s28, %s2755_s27 }
  0x1c   : > { %p262_p10 = scmp.eq.s32.totalorder %s2148_s18, 7  ;;  %s3669_s21 = smov (%p42_p7, %s3667_s21), 0 }
  0x1d   : > { %3632 = sst [smem:[#allocation17_spill]] %s3669_s21  ;;  %p2947_p11 = por %p256_p8, %p140_p5 }
  0x1e   : > { %p2951_p12 = por %p262_p10, %p261_p9  ;;  %s72_s20 = ssub.s32 %s2795_s15, %s3669_s21 }
  0x1f   : > { %s133_s6 = sadd.s32 1, %s2763_s29  ;;  %s74_s7 = sor.u32 %s73_s23, %s72_s20 }
  0x20   : > { %s3634_s8 = scalar_select %p2951_p12, 1, 0 }
  0x21   : > { %s130_s5 = sor.u32 %s129_s25, %s72_s20  ;;  %p75_p13 = scmp.eq.s32.totalorder %s74_s7, 0 }
  0x22   : > { %3635 = sst [smem:[#allocation18_spill]] %s3634_s8  ;;  %p131_p0 = scmp.eq.s32.totalorder %s130_s5, 0 }
  0x23   : > { %s2959_s17 = scalar_select %p75_p13, %s2771_s9, %s77_s22  }
  0x24   : > { %s2962_s18 = scalar_select %p131_p0, %s2763_s29, %s133_s6  }
  0x25   : > { %3636 = sst [smem:[#allocation19_spill]] %s2959_s17  ;;  %p2150_p1 = scmp.ge.s32.totalorder %s2799_s16, 8 }
  0x27   : > { %290 = sbr.rel (%p2150_p1) target bundleno = 66 (0x42), region = 32 }
  0x2c   : > { %306 = sbr.rel (!%p2928_p4) target bundleno = 55 (0x37), region = 40  ;;  %s308_s8 = sand.u32 (%p2928_p4), 1, %s2771_s9  }
  0x2d   : > { %s2152_s21 = sshll.u32 (%p2928_p4), %s2795_s15, 2  ;;  %s2151_s27 = sshll.u32 (%p2928_p4), %s308_s8, 3 }
  0x2e   : > { %s312_s23 = sadd.s32 (%p2928_p4), %s2787_s13, %s2152_s21  ;;  %s3637_s1 = sld [smem:[#allocation20_spill]] (%p2928_p4) }
  0x2f   : > { %s2153_s20 = sshll.u32 (%p2928_p4), %s312_s23, 2  ;;  %s310_s6 = scalar_lea.vmem (%p2928_p4), [#allocation6], %s2151_s27 }
  0x34   : > { %s314_s22 = scalar_lea.vmem %s3637_s1, %s2153_s20 }
  0x35   : > { %v331_v0 = vld [vmem:[%s314_s22] sm:$0xf]  ;;  %v333_v1 = vld [vmem:[%s314_s22 + $0x8] sm:$0xf] }
  0x36   : > { %332 = vst [vmem:[%s310_s6] sm:$0xf] %v331_v0  ;;  %334 = vst [vmem:[%s310_s6 + $0x4] sm:$0xf] %v333_v1 }
  0x37 PF: > { %375 = sbr.rel (!%p2939_p6) target bundleno = 66 (0x42), region = 85  ;;  %s377_s24 = sand.u32 (%p2939_p6), 1, %s2763_s29  }
  0x38   : > { %s2155_s8 = sshll.u32 (%p2939_p6), %s2795_s15, 2  ;;  %s2154_s21 = sshll.u32 (%p2939_p6), %s377_s24, 4 }
  0x39   : > { %s381_s25 = sadd.s32 (%p2939_p6), %s2791_s14, %s2155_s8  ;;  %s3638_s3 = sld [smem:[#allocation21_spill]] (%p2939_p6) }
  0x3a   : > { %s2156_s23 = sshll.u32 (%p2939_p6), %s381_s25, 3  ;;  %s379_s27 = scalar_lea.vmem (%p2939_p6), [#allocation7], %s2154_s21 }
  0x3f   : > { %s383_s20 = scalar_lea.vmem %s3638_s3, %s2156_s23 }
  0x40   : > { %v414_v2 = vld [vmem:[%s383_s20] sm:$0xff]  ;;  %v416_v3 = vld [vmem:[%s383_s20 + $0x10] sm:$0xff] }
  0x41   : > { %415 = vst [vmem:[%s379_s27] sm:$0xff] %v414_v2  ;;  %417 = vst [vmem:[%s379_s27 + $0x8] sm:$0xff] %v416_v3 }
  0x42 PF: > { %p2157_p2 = scmp.ge.s32.totalorder %s2799_s16, 1  ;;  %p422_p3 = scmp.lt.s32.totalorder %s2799_s16, 9 }
  0x44   : > { %p423_p4 = pnand %p2157_p2, %p422_p3 }
  0x45   : > { %s429_s13 = sand.u32 (!%p423_p4), 1, %s2767_s30   ;;  %s3615_s26 = sand.u32 (!%p423_p4), 1, %s2759_s28  }
  0x46   : > { %426 = sbr.rel (%p423_p4) target bundleno = 1474 (0x5c2), region = 123  ;;  %s2985_s5 = sshll.u32 (!%p423_p4), %s429_s13, 3 }
  0x47   : > { %s2989_s22 = sshll.u32 (!%p423_p4), %s3615_s26, 4  ;;  %s2161_s6 = sshll.u32 (!%p423_p4), %s2779_s11, 4 }
  0x48   : > { %p492_p5 = scmp.lt.s32.totalorder (!%p423_p4), %s2783_s12, 1  ;;  %p494_p6 = scmp.lt.s32.totalorder (!%p423_p4), %s2161_s6, 31 }
  0x49   : > { %s2164_s24 = sshll.u32 (!%p423_p4), %s2775_s10, 4  ;;  %s431_s15 = scalar_lea.vmem (!%p423_p4), [#allocation6], %s2985_s5 }
  0x4a   : > { %p504_p7 = scmp.lt.s32.totalorder (!%p423_p4), %s2164_s24, 31  ;;  %s438_s14 = scalar_lea.vmem (!%p423_p4), [#allocation7], %s2989_s22 }
  0x4b   : > { %s493_s8 = scalar_select %p492_p5, %s2783_s12, 1 }
  0x4c   : > { %s3671_s6 = smov (!%p494_p6, %s2161_s6), 31  ;;  %s3673_s24 = smov (!%p504_p7, %s2164_s24), 31 }
  0x4d   : > { %s2162_s21 = sshll.u32 %s493_s8, 5  ;;  %s3008_s17 = scalar_lea.vmem [#allocation8], %s2989_s22 }
  0x4e   : > { %s497_s25 = sadd.s32 %s2162_s21, %s3671_s6  ;;  %s507_s27 = sadd.s32 %s2162_s21, %s3673_s24 }
  0x4f   : > { %s2163_s23 = sshll.u32 %s497_s25, 2  ;;  %s2166_s13 = sshll.u32 %s507_s27, 2 }
  0x50   : > { %s2998_s20 = scalar_lea.vmem %s3597_s0, %s2163_s23  ;;  %s3003_s3 = scalar_lea.vmem %s3599_s2, %s2166_s13 }
  0x51   : > { %p2167_p8 = scmp.ne.s32.totalorder %s2775_s10, 0 }
  0x52   : > { %s3639_s24 = sld [smem:[#allocation22_spill]] (!%p2167_p8) }
  0x53   : > { %515 = sbr.rel (%p2167_p8) target bundleno = 305 (0x131), region = 135 }
  0x58   : > { %v2549_v4 = vld [vmem:[%s3601_s4] sm:$0xff]   ;;  %vm516_vm0 = vcmask 7168   ;;  %vm549_vm1 = vcmask 130048   ;;  %v2801_v6 = vmov -inf   ;;  %v2802_v7 = vmov 0.0   ;;  %v2552_v9 = vld [vmem:[%s2998_s20 + $0x8] sm:$0xff]  }
  0x59   : > { %v2550_v5 = vld [vmem:[%s2998_s20] sm:$0xff]   ;;  %2318 = vmatprep.subr.bf16.mxu0 %v2549_v4  ;;  %2421 = vmatprep.subr.bf16.mxu1 %v2549_v4  ;;  %517 = vst.msk [vmem:[#allocation2] sm:$0xff] %vm516_vm0, %v2801_v6  ;;  %518 = vst.msk [vmem:[#allocation2 + $0x8] sm:$0xff] %vm516_vm0, %v2801_v6  ;;  %v2553_v10 = vld [vmem:[%s2998_s20 + $0x28] sm:$0xff]   ;;  %v586_v15 = vlaneseq  ;;  %vm821_vm2 = vcmask 125952  }
  0x5a   : > { %519 = vst.msk [vmem:[#allocation2 + $0x10] sm:$0xff] %vm516_vm0, %v2801_v6  ;;  %520 = vst.msk [vmem:[#allocation2 + $0x18] sm:$0xff] %vm516_vm0, %v2801_v6  ;;  %2319 = vmatpush3.bf16.msra.mxu0 %v2549_v4  ;;  %2422 = vmatpush3.bf16.msra.mxu1 %v2549_v4  ;;  %v2551_v8 = vld [vmem:[%s2998_s20 + $0x20] sm:$0xff]   ;;  %v2554_v11 = vld [vmem:[%s2998_s20 + $0x10] sm:$0xff]  }
  0x5b   : > { %521 = vst.msk [vmem:[#allocation2 + $0x20] sm:$0xff] %vm516_vm0, %v2801_v6  ;;  %522 = vst.msk [vmem:[#allocation2 + $0x28] sm:$0xff] %vm516_vm0, %v2801_v6  ;;  %2320 = vmatprep.mubr.msk.bf16.mxu0 %vm549_vm1, %v2550_v5  ;;  %2328 = vmatprep.mubr.msk.bf16.mxu1 %vm549_vm1, %v2551_v8  ;;  %v2555_v12 = vld [vmem:[%s2998_s20 + $0x30] sm:$0xff]   ;;  %v2556_v13 = vld [vmem:[%s2998_s20 + $0x18] sm:$0xff]   ;;  %v587_v16 = vshrl.u32 %v586_v15, 7 }
  0x5c   : > { %523 = vst.msk [vmem:[#allocation2 + $0x30] sm:$0xff] %vm516_vm0, %v2801_v6  ;;  %524 = vst.msk [vmem:[#allocation2 + $0x38] sm:$0xff] %vm516_vm0, %v2801_v6  ;;  %v2557_v14 = vld [vmem:[%s2998_s20 + $0x38] sm:$0xff]   ;;  %v584_v17 = vld [vmem:[%s3639_s24] sm:$0x1] }
  0x5d   : > { %525 = vst.msk [vmem:[#allocation2 + $0x40] sm:$0xff] %vm516_vm0, %v2801_v6  ;;  %526 = vst.msk [vmem:[#allocation2 + $0x48] sm:$0xff] %vm516_vm0, %v2801_v6  ;;  %2321 = vmatmul.mubr.msk.bf16.vlgmr.msra.gmra.mxu0 %vm549_vm1, %v2552_v9  ;;  %2329 = vmatmul.mubr.msk.bf16.vlgmr.msra.gmra.mxu1 %vm549_vm1, %v2553_v10  ;;  %v585_v18 = vunpack.c.l.bf16 %v584_v17  ;;  %v588_v19 = vsub.s32 0, %v587_v16 }
  0x5e   : > { %527 = vst.msk [vmem:[#allocation2 + $0x50] sm:$0xff] %vm516_vm0, %v2801_v6  ;;  %528 = vst.msk [vmem:[#allocation2 + $0x58] sm:$0xff] %vm516_vm0, %v2801_v6  ;;  %2324 = vmatprep.mubr.msk.bf16.mxu0 %vm549_vm1, %v2554_v11  ;;  %2332 = vmatprep.mubr.msk.bf16.mxu1 %vm549_vm1, %v2555_v12 }
  0x5f   : > { %529 = vst.msk [vmem:[#allocation2 + $0x60] sm:$0xff] %vm516_vm0, %v2801_v6  ;;  %530 = vst.msk [vmem:[#allocation2 + $0x68] sm:$0xff] %vm516_vm0, %v2801_v6  ;;  %v589_v20 = vrot.slane %v585_v18, %v588_v19 }
  0x60   : > { %531 = vst.msk [vmem:[#allocation2 + $0x70] sm:$0xff] %vm516_vm0, %v2801_v6  ;;  %532 = vst.msk [vmem:[#allocation2 + $0x78] sm:$0xff] %vm516_vm0, %v2801_v6 }
  0x61   : > { %533 = vst.msk [vmem:[#allocation3] sm:$0xff] %vm516_vm0, %v2802_v7  ;;  %534 = vst.msk [vmem:[#allocation3 + $0x8] sm:$0xff] %vm516_vm0, %v2802_v7 }
  0x62   : > { %535 = vst.msk [vmem:[#allocation3 + $0x10] sm:$0xff] %vm516_vm0, %v2802_v7  ;;  %536 = vst.msk [vmem:[#allocation3 + $0x18] sm:$0xff] %vm516_vm0, %v2802_v7 }
  0x63   : > { %537 = vst.msk [vmem:[#allocation3 + $0x20] sm:$0xff] %vm516_vm0, %v2802_v7  ;;  %538 = vst.msk [vmem:[#allocation3 + $0x28] sm:$0xff] %vm516_vm0, %v2802_v7 }
  0x64   : > { %539 = vst.msk [vmem:[#allocation3 + $0x30] sm:$0xff] %vm516_vm0, %v2802_v7  ;;  %540 = vst.msk [vmem:[#allocation3 + $0x38] sm:$0xff] %vm516_vm0, %v2802_v7 }
  0x65   : > { %541 = vst.msk [vmem:[#allocation3 + $0x40] sm:$0xff] %vm516_vm0, %v2802_v7  ;;  %542 = vst.msk [vmem:[#allocation3 + $0x48] sm:$0xff] %vm516_vm0, %v2802_v7  ;;  %2325 = vmatmul.mubr.msk.bf16.gmra.mxu0 %vm549_vm1, %v2556_v13  ;;  %2333 = vmatmul.mubr.msk.bf16.gmra.mxu1 %vm549_vm1, %v2557_v14 }
  0x66   : > { %543 = vst.msk [vmem:[#allocation3 + $0x50] sm:$0xff] %vm516_vm0, %v2802_v7  ;;  %544 = vst.msk [vmem:[#allocation3 + $0x58] sm:$0xff] %vm516_vm0, %v2802_v7 }
  0x67   : > { %545 = vst.msk [vmem:[#allocation3 + $0x60] sm:$0xff] %vm516_vm0, %v2802_v7  ;;  %546 = vst.msk [vmem:[#allocation3 + $0x68] sm:$0xff] %vm516_vm0, %v2802_v7 }
  0x68   : > { %547 = vst.msk [vmem:[#allocation3 + $0x70] sm:$0xff] %vm516_vm0, %v2802_v7  ;;  %548 = vst.msk [vmem:[#allocation3 + $0x78] sm:$0xff] %vm516_vm0, %v2802_v7 }
  0x69   : > { %550 = vst.msk [vmem:[#allocation4] sm:$0xff] %vm549_vm1, %v2802_v7  ;;  %551 = vst.msk [vmem:[#allocation4 + $0x8] sm:$0xff] %vm549_vm1, %v2802_v7 }
  0x6a   : > { %552 = vst.msk [vmem:[#allocation4 + $0x10] sm:$0xff] %vm549_vm1, %v2802_v7  ;;  %553 = vst.msk [vmem:[#allocation4 + $0x18] sm:$0xff] %vm549_vm1, %v2802_v7 }
  0x6b   : > { %554 = vst.msk [vmem:[#allocation4 + $0x20] sm:$0xff] %vm549_vm1, %v2802_v7  ;;  %555 = vst.msk [vmem:[#allocation4 + $0x28] sm:$0xff] %vm549_vm1, %v2802_v7 }
  0x6c   : > { %556 = vst.msk [vmem:[#allocation4 + $0x30] sm:$0xff] %vm549_vm1, %v2802_v7  ;;  %557 = vst.msk [vmem:[#allocation4 + $0x38] sm:$0xff] %vm549_vm1, %v2802_v7 }
  0x6d   : > { %558 = vst.msk [vmem:[#allocation4 + $0x40] sm:$0xff] %vm549_vm1, %v2802_v7  ;;  %559 = vst.msk [vmem:[#allocation4 + $0x48] sm:$0xff] %vm549_vm1, %v2802_v7 }
  0x6e   : > { %560 = vst.msk [vmem:[#allocation4 + $0x50] sm:$0xff] %vm549_vm1, %v2802_v7  ;;  %561 = vst.msk [vmem:[#allocation4 + $0x58] sm:$0xff] %vm549_vm1, %v2802_v7 }
  0x6f   : > { %562 = vst.msk [vmem:[#allocation4 + $0x60] sm:$0xff] %vm549_vm1, %v2802_v7  ;;  %563 = vst.msk [vmem:[#allocation4 + $0x68] sm:$0xff] %vm549_vm1, %v2802_v7 }
  0x70   : > { %564 = vst.msk [vmem:[#allocation4 + $0x70] sm:$0xff] %vm549_vm1, %v2802_v7  ;;  %565 = vst.msk [vmem:[#allocation4 + $0x78] sm:$0xff] %vm549_vm1, %v2802_v7 }
 0x11d   : > { %v2322_v21 = vpop.f32.mrf.mxu0  ;;  %v2330_v23 = vpop.f32.mrf.mxu1 }
 0x11e   : > { %v703_v22 = vadd.f32 %v2322_v21, %v589_v20  ;;  %v735_v24 = vadd.f32 %v2330_v23, %v589_v20 }
 0x11f   : > { %v694_v25 = vpop.f32.mrf.mxu0  ;;  %v726_v28 = vpop.f32.mrf.mxu1 }
 0x120   : > { %v2252_v26 = vpack.c.bf16 %v703_v22, %v703_v22  ;;  %v695_v27 = vadd.f32 %v694_v25, %v589_v20  ;;  %v2260_v29 = vpack.c.bf16 %v735_v24, %v735_v24  ;;  %v727_v30 = vadd.f32 %v726_v28, %v589_v20 }
 0x121   : > { %v2323_v31 = vpop.f32.mrf.mxu0  ;;  %v2331_v34 = vpop.f32.mrf.mxu1 }
 0x122   : > { %824 = vst.msk [vmem:[#allocation5 + $0x8] sm:$0xf] %vm821_vm2, %v2252_v26  ;;  %v2250_v32 = vpack.c.bf16 %v695_v27, %v695_v27  ;;  %v706_v33 = vadd.f32 %v2323_v31, %v589_v20  ;;  %832 = vst.msk [vmem:[#allocation5 + $0x28] sm:$0xf] %vm821_vm2, %v2260_v29  ;;  %v2258_v35 = vpack.c.bf16 %v727_v30, %v727_v30 }
 0x123   : > { %v738_v36 = vadd.f32 %v2331_v34, %v589_v20  ;;  %v697_v37 = vpop.f32.mrf.mxu0  ;;  %v729_v40 = vpop.f32.mrf.mxu1 }
 0x124   : > { %822 = vst.msk [vmem:[#allocation5] sm:$0xf] %vm821_vm2, %v2250_v32  ;;  %v2253_v38 = vpack.c.bf16 %v706_v33, %v706_v33  ;;  %v698_v39 = vadd.f32 %v697_v37, %v589_v20  ;;  %830 = vst.msk [vmem:[#allocation5 + $0x20] sm:$0xf] %vm821_vm2, %v2258_v35  ;;  %v730_v42 = vadd.f32 %v729_v40, %v589_v20 }
 0x125   : > { %v2261_v41 = vpack.c.bf16 %v738_v36, %v738_v36  ;;  %v2326_v43 = vpop.f32.mrf.mxu0  ;;  %v2334_v46 = vpop.f32.mrf.mxu1 }
 0x126   : > { %825 = vst.msk [vmem:[#allocation5 + $0xc] sm:$0xf] %vm821_vm2, %v2253_v38  ;;  %v2251_v44 = vpack.c.bf16 %v698_v39, %v698_v39  ;;  %v719_v45 = vadd.f32 %v2326_v43, %v589_v20  ;;  %v2259_v47 = vpack.c.bf16 %v730_v42, %v730_v42  ;;  %v751_v48 = vadd.f32 %v2334_v46, %v589_v20 }
 0x127   : > { %833 = vst.msk [vmem:[#allocation5 + $0x2c] sm:$0xf] %vm821_vm2, %v2261_v41  ;;  %v710_v49 = vpop.f32.mrf.mxu0  ;;  %v742_v52 = vpop.f32.mrf.mxu1 }
 0x128   : > { %823 = vst.msk [vmem:[#allocation5 + $0x4] sm:$0xf] %vm821_vm2, %v2251_v44  ;;  %v2256_v50 = vpack.c.bf16 %v719_v45, %v719_v45  ;;  %v711_v51 = vadd.f32 %v710_v49, %v589_v20  ;;  %831 = vst.msk [vmem:[#allocation5 + $0x24] sm:$0xf] %vm821_vm2, %v2259_v47  ;;  %v2264_v53 = vpack.c.bf16 %v751_v48, %v751_v48 }
 0x129   : > { %v743_v54 = vadd.f32 %v742_v52, %v589_v20  ;;  %v2327_v55 = vpop.f32.mrf.mxu0  ;;  %v2335_v58 = vpop.f32.mrf.mxu1 }
 0x12a   : > { %828 = vst.msk [vmem:[#allocation5 + $0x18] sm:$0xf] %vm821_vm2, %v2256_v50  ;;  %v2254_v56 = vpack.c.bf16 %v711_v51, %v711_v51  ;;  %v722_v57 = vadd.f32 %v2327_v55, %v589_v20  ;;  %836 = vst.msk [vmem:[#allocation5 + $0x38] sm:$0xf] %vm821_vm2, %v2264_v53  ;;  %v754_v60 = vadd.f32 %v2335_v58, %v589_v20 }
 0x12b   : > { %v2262_v59 = vpack.c.bf16 %v743_v54, %v743_v54  ;;  %v713_v61 = vpop.f32.mrf.mxu0  ;;  %v745_v0 = vpop.f32.mrf.mxu1 }
 0x12c   : > { %826 = vst.msk [vmem:[#allocation5 + $0x10] sm:$0xf] %vm821_vm2, %v2254_v56  ;;  %v2257_v62 = vpack.c.bf16 %v722_v57, %v722_v57  ;;  %v714_v63 = vadd.f32 %v713_v61, %v589_v20  ;;  %v2265_v1 = vpack.c.bf16 %v754_v60, %v754_v60  ;;  %v746_v2 = vadd.f32 %v745_v0, %v589_v20 }
 0x12d   : > { %834 = vst.msk [vmem:[#allocation5 + $0x30] sm:$0xf] %vm821_vm2, %v2262_v59 }
 0x12e   : > { %829 = vst.msk [vmem:[#allocation5 + $0x1c] sm:$0xf] %vm821_vm2, %v2257_v62  ;;  %v2255_v3 = vpack.c.bf16 %v714_v63, %v714_v63  ;;  %837 = vst.msk [vmem:[#allocation5 + $0x3c] sm:$0xf] %vm821_vm2, %v2265_v1  ;;  %v2263_v4 = vpack.c.bf16 %v746_v2, %v746_v2 }
 0x130   : > { %827 = vst.msk [vmem:[#allocation5 + $0x14] sm:$0xf] %vm821_vm2, %v2255_v3  ;;  %835 = vst.msk [vmem:[#allocation5 + $0x34] sm:$0xf] %vm821_vm2, %v2263_v4 }
 0x131 PF: > { %v2560_v5 = vld [vmem:[%s431_s15] sm:$0xff]   ;;  %vm902_vm3 = vcmask 130048   ;;  %v2803_v27 = vmov 0   ;;  %vm1352_vm4 = vcmask 7168   ;;  %v3167_v37 = vld [vmem:[#allocation2 + $0x30] sm:$0xff]  ;;  %v2569_v39 = vld [vmem:[%s3003_s3 + $0x38] sm:$0xff]  }
 0x132   : > { %v2561_v6 = vld [vmem:[#allocation5] sm:$0xff]   ;;  %2336 = vmatprep.subr.bf16.mxu0 %v2560_v5  ;;  %v2562_v7 = vld [vmem:[#allocation5 + $0x8] sm:$0xff]   ;;  %2559 = vset.pattern.permute.xlu1 %v2803_v27  ;;  %v3180_v44 = vld [vmem:[#allocation2 + $0x38] sm:$0xff]  ;;  %p2226_p9 = scmp.ne.s32.totalorder %s2775_s10, 1 }
 0x133   : > { %2337 = vmatpush3.bf16.msra.mxu0 %v2560_v5  ;;  %2338 = vmatprep.mubr.msk.bf16.mxu0 %vm902_vm3, %v2561_v6  ;;  %v2565_v10 = vld [vmem:[#allocation5 + $0x20] sm:$0xff]   ;;  %v2566_v11 = vld [vmem:[#allocation5 + $0x28] sm:$0xff]   ;;  %v2570_v46 = vld [vmem:[%s3003_s3 + $0x30] sm:$0xff]   ;;  %s3640_s15 = sld [smem:[#allocation24_spill]] (!%p2226_p9) }
 0x134   : > { %2558 = vset.pattern.permute.xlu0 %v2803_v27  ;;  %v3155_v31 = vld [vmem:[#allocation2] sm:$0xff]  ;;  %v3160_v34 = vld [vmem:[#allocation2 + $0x8] sm:$0xff]  ;;  %2423 = vmatprep.subr.bf16.mxu1 %v2569_v39  ;;  %v1027_v51 = vld [vmem:[#allocation2 + $0x18] sm:$0xff]  ;;  %s3642_s7 = sld [smem:[#allocation23_spill]] (!%p2226_p9) }
 0x135   : > { %v2564_v9 = vld [vmem:[#allocation5 + $0x18] sm:$0xff]   ;;  %v3169_v38 = vld [vmem:[#allocation2 + $0x20] sm:$0xff]  ;;  %2354 = vmatprep.subr.bf16.mxu0 %v2569_v39  ;;  %v3182_v45 = vld [vmem:[#allocation2 + $0x28] sm:$0xff]  ;;  %2431 = vmatpush3.bf16.msra.mxu1 %v2569_v39 }
 0x136   : > { %2339 = vmatmul.mubr.msk.bf16.vlgmr.msra.gmra.mxu0 %vm902_vm3, %v2562_v7  ;;  %v2568_v13 = vld [vmem:[#allocation5 + $0x38] sm:$0xff]   ;;  %2424 = vmatprep.subr.bf16.mxu1 %v2570_v46  ;;  %v3197_v52 = vld [vmem:[#allocation2 + $0x50] sm:$0xff]  ;;  %v2571_v53 = vld [vmem:[%s3003_s3 + $0x28] sm:$0xff]  }
 0x137   : > { %v2563_v8 = vld [vmem:[#allocation5 + $0x10] sm:$0xff]   ;;  %2355 = vmatpush3.bf16.msra.mxu0 %v2569_v39  ;;  %v3209_v58 = vld [vmem:[#allocation2 + $0x40] sm:$0xff]  ;;  %v3211_v59 = vld [vmem:[#allocation2 + $0x58] sm:$0xff] }
 0x138   : > { %2342 = vmatprep.mubr.msk.bf16.mxu0 %vm902_vm3, %v2563_v8  ;;  %v2567_v12 = vld [vmem:[#allocation5 + $0x30] sm:$0xff]   ;;  %2356 = vmatprep.subr.bf16.mxu0 %v2570_v46  ;;  %v2572_v60 = vld [vmem:[%s3003_s3 + $0x20] sm:$0xff]   ;;  %v3228_v3 = vld [vmem:[#allocation2 + $0x48] sm:$0xff] }
 0x139   : > { %2432 = vmatpush3.bf16.msra.mxu1 %v2570_v46  ;;  %v3226_v2 = vld [vmem:[#allocation2 + $0x10] sm:$0xff]  ;;  %v2573_v4 = vld [vmem:[%s3003_s3 + $0x18] sm:$0xff]   ;;  %s3641_s5 = smov (!%p2226_p9), %s3640_s15 }
 0x13a   : > { %2425 = vmatprep.subr.bf16.mxu1 %v2571_v53 }
 0x13b   : > { %2357 = vmatpush3.bf16.msra.mxu0 %v2570_v46 }
 0x13c   : > { %2358 = vmatprep.subr.bf16.mxu0 %v2571_v53 }
 0x13d   : > { %2433 = vmatpush3.bf16.msra.mxu1 %v2571_v53 }
 0x13e   : > { %2343 = vmatmul.mubr.msk.bf16.gmra.mxu0 %vm902_vm3, %v2564_v9  ;;  %2426 = vmatprep.subr.bf16.mxu1 %v2572_v60 }
 0x13f   : > { %2346 = vmatprep.mubr.msk.bf16.mxu0 %vm902_vm3, %v2565_v10  ;;  %2359 = vmatpush3.bf16.msra.mxu0 %v2571_v53 }
 0x140   : > { %2360 = vmatprep.subr.bf16.mxu0 %v2572_v60 }
 0x141   : > { %2434 = vmatpush3.bf16.msra.mxu1 %v2572_v60 }
 0x142   : > { %2427 = vmatprep.subr.bf16.mxu1 %v2573_v4 }
 0x143   : > { %2361 = vmatpush3.bf16.msra.mxu0 %v2572_v60 }
 0x144   : > { %2362 = vmatprep.subr.bf16.mxu0 %v2573_v4 }
 0x145   : > { %2435 = vmatpush3.bf16.msra.mxu1 %v2573_v4 }
 0x146   : > { %2347 = vmatmul.mubr.msk.bf16.gmra.mxu0 %vm902_vm3, %v2566_v11  ;;  %v3242_v11 = vld [vmem:[#allocation2 + $0x78] sm:$0xff] }
 0x147   : > { %2350 = vmatprep.mubr.msk.bf16.mxu0 %vm902_vm3, %v2567_v12  ;;  %v3244_v12 = vld [vmem:[#allocation2 + $0x60] sm:$0xff]  ;;  %2363 = vmatpush3.bf16.msra.mxu0 %v2573_v4 }
 0x14e   : > { %2351 = vmatmul.mubr.msk.bf16.gmra.mxu0 %vm902_vm3, %v2568_v13  ;;  %v2574_v13 = vld [vmem:[%s3003_s3 + $0x10] sm:$0xff]  }
 0x14f   : > { %2428 = vmatprep.subr.bf16.mxu1 %v2574_v13  ;;  %2364 = vmatprep.subr.bf16.mxu0 %v2574_v13 }
 0x150   : > { %2436 = vmatpush3.bf16.msra.mxu1 %v2574_v13  ;;  %2365 = vmatpush3.bf16.msra.mxu0 %v2574_v13 }
 0x1f6   : > { %v3107_v14 = vpop.f32.mrf.mxu0 }
 0x1f8   : > { %v3109_v15 = vpop.f32.mrf.mxu0 }
 0x1f9   : > { %1040 = vmax.xlane.f32.xlu0 %v3109_v15 }
 0x1fa   : > { %v3112_v16 = vpop.f32.mrf.mxu0 }
 0x1fc   : > { %v3114_v17 = vpop.f32.mrf.mxu0 }
 0x1fd   : > { %1042 = vmax.xlane.f32.xlu1 %v3114_v17 }
 0x1fe   : > { %v3117_v18 = vpop.f32.mrf.mxu0 }
 0x200   : > { %v3119_v19 = vpop.f32.mrf.mxu0 }
 0x201   : > { %1052 = vmax.xlane.f32.xlu1 %v3117_v18  ;;  %1048 = vmax.xlane.f32.xlu0 %v3119_v19 }
 0x202   : > { %v3123_v20 = vpop.f32.mrf.mxu0 }
 0x204   : > { %v3125_v21 = vpop.f32.mrf.mxu0 }
 0x205   : > { %1054 = vmax.xlane.f32.xlu1 %v3123_v20  ;;  %1050 = vmax.xlane.f32.xlu0 %v3125_v21 }
 0x206   : > { %v3129_v22 = vpop.f32.mrf.mxu0 }
 0x208   : > { %v3131_v23 = vpop.f32.mrf.mxu0 }
 0x209   : > { %1046 = vmax.xlane.f32.xlu1 %v3112_v16  ;;  %1060 = vmax.xlane.f32.xlu0 %v3129_v22 }
 0x20a   : > { %v3135_v24 = vpop.f32.mrf.mxu0 }
 0x20c   : > { %v3137_v25 = vpop.f32.mrf.mxu0 }
 0x20d   : > { %1056 = vmax.xlane.f32.xlu0 %v3131_v23  ;;  %1062 = vmax.xlane.f32.xlu1 %v3135_v24 }
 0x20e   : > { %v3141_v26 = vpop.f32.mrf.mxu0 }
 0x210   : > { %v3143_v28 = vpop.f32.mrf.mxu0 }
 0x211   : > { %1044 = vmax.xlane.f32.xlu0 %v3107_v14  ;;  %1058 = vmax.xlane.f32.xlu1 %v3137_v25 }
 0x212   : > { %v3147_v29 = vpop.f32.mrf.mxu0 }
 0x214   : > { %v3151_v30 = vpop.f32.mrf.mxu0 }
 0x215   : > { %1070 = vmax.xlane.f32.xlu1 %v3147_v29  ;;  %1064 = vmax.xlane.f32.xlu0 %v3143_v28 }
 0x219   : > { %1066 = vmax.xlane.f32.xlu1 %v3151_v30  ;;  %1068 = vmax.xlane.f32.xlu0 %v3141_v26 }
 0x282   : > { %v1041_v32 = vpop.xlane.xlu0 %1040 }
 0x283   : > { %v3158_v33 = vmax.f32 %v3155_v31, %v1041_v32 }
 0x285   : > { %1674 = vst.msk [vmem:[#allocation2] sm:$0xff] %vm1352_vm4, %v3158_v33  ;;  %v1088_v61 = vsub.f32 %v3155_v31, %v3158_v33 }
 0x286   : > { %v1043_v35 = vpop.xlane.xlu1 %1042 }
 0x287   : > { %v3165_v36 = vmax.f32 %v3160_v34, %v1043_v35  ;;  %v1104_v5 = vmul.f32 1.442695, %v1088_v61 }
 0x289   : > { %1675 = vst.msk [vmem:[#allocation2 + $0x8] sm:$0xff] %vm1352_vm4, %v3165_v36  ;;  %2577 = vpow2.f32 %v1104_v5 }
 0x28a   : > { %v1053_v40 = vpop.xlane.xlu1 %1052  ;;  %v1049_v41 = vpop.xlane.xlu0 %1048 }
 0x28b   : > { %v3175_v42 = vmax.f32 %v3167_v37, %v1053_v40  ;;  %v3178_v43 = vmax.f32 %v3169_v38, %v1049_v41  ;;  %v1037_v40 = vld [vmem:[#allocation2 + $0x68] sm:$0xff]  ;;  %v3260_v41 = vld [vmem:[#allocation2 + $0x70] sm:$0xff] }
 0x28d   : > { %1680 = vst.msk [vmem:[#allocation2 + $0x30] sm:$0xff] %vm1352_vm4, %v3175_v42  ;;  %1678 = vst.msk [vmem:[#allocation2 + $0x20] sm:$0xff] %vm1352_vm4, %v3178_v43  ;;  %1158 = vperm.xlu0 %2558, %v3178_v43   ;;  %1168 = vperm.xlu1 %2559, %v3175_v42   ;;  %v1092_v61 = vsub.f32 %v3169_v38, %v3178_v43 }
 0x28e   : > { %v1055_v47 = vpop.xlane.xlu1 %1054  ;;  %v1051_v48 = vpop.xlane.xlu0 %1050 }
 0x28f   : > { %v3192_v49 = vmax.f32 %v3180_v44, %v1055_v47  ;;  %v3195_v50 = vmax.f32 %v3182_v45, %v1051_v48  ;;  %v1089_v47 = vsub.f32 %v3160_v34, %v3165_v36  ;;  %v1112_v4 = vmul.f32 1.442695, %v1092_v61 }
 0x291   : > { %1681 = vst.msk [vmem:[#allocation2 + $0x38] sm:$0xff] %vm1352_vm4, %v3192_v49  ;;  %1679 = vst.msk [vmem:[#allocation2 + $0x28] sm:$0xff] %vm1352_vm4, %v3195_v50  ;;  %1143 = vperm.xlu0 %2558, %v3165_v36   ;;  %1138 = vperm.xlu1 %2559, %v3158_v33   ;;  %v1095_v32 = vsub.f32 %v3180_v44, %v3192_v49  ;;  %v2575_v44 = vld [vmem:[%s3003_s3 + $0x8] sm:$0xff]   ;;  %v1093_v48 = vsub.f32 %v3182_v45, %v3195_v50  ;;  %v2576_v36 = vld [vmem:[%s3003_s3] sm:$0xff]   ;;  %v1106_v45 = vmul.f32 1.442695, %v1089_v47 }
 0x292   : > { %v1047_v54 = vpop.xlane.xlu1 %1046  ;;  %v1061_v55 = vpop.xlane.xlu0 %1060  ;;  %2429 = vmatprep.subr.bf16.mxu1 %v2575_v44  ;;  %2366 = vmatprep.subr.bf16.mxu0 %v2575_v44 }
 0x293   : > { %v1075_v56 = vmax.f32 %v1027_v51, %v1047_v54  ;;  %v3207_v57 = vmax.f32 %v3197_v52, %v1061_v55  ;;  %v1118_v53 = vmul.f32 1.442695, %v1095_v32  ;;  %2437 = vmatpush3.bf16.msra.mxu1 %v2575_v44  ;;  %2367 = vmatpush3.bf16.msra.mxu0 %v2575_v44 }
 0x294   : > { %2430 = vmatprep.subr.bf16.mxu1 %v2576_v36  ;;  %2368 = vmatprep.subr.bf16.mxu0 %v2576_v36 }
 0x295   : > { %1677 = vst.msk [vmem:[#allocation2 + $0x18] sm:$0xff] %vm1352_vm4, %v1075_v56  ;;  %1684 = vst.msk [vmem:[#allocation2 + $0x50] sm:$0xff] %vm1352_vm4, %v3207_v57  ;;  %1153 = vperm.xlu0 %2558, %v1075_v56   ;;  %1173 = vperm.xlu1 %2559, %v3192_v49   ;;  %v1091_v8 = vsub.f32 %v1027_v51, %v1075_v56  ;;  %v1114_v56 = vmul.f32 1.442695, %v1093_v48 }
 0x296   : > { %v1057_v62 = vpop.xlane.xlu0 %1056  ;;  %v1063_v63 = vpop.xlane.xlu1 %1062 }
 0x297   : > { %v3221_v0 = vmax.f32 %v3209_v58, %v1057_v62  ;;  %v3224_v1 = vmax.f32 %v3211_v59, %v1063_v63  ;;  %v1110_v33 = vmul.f32 1.442695, %v1091_v8  ;;  %2438 = vmatpush3.bf16.msra.mxu1 %v2576_v36  ;;  %2369 = vmatpush3.bf16.msra.mxu0 %v2576_v36  ;;  %v3292_v63 = vpop.eup %2577 }
 0x299   : > { %1682 = vst.msk [vmem:[#allocation2 + $0x40] sm:$0xff] %vm1352_vm4, %v3221_v0  ;;  %1685 = vst.msk [vmem:[#allocation2 + $0x58] sm:$0xff] %vm1352_vm4, %v3224_v1  ;;  %1163 = vperm.xlu1 %2559, %v3195_v50   ;;  %2579 = vpow2.f32 %v1110_v33  ;;  %v1099_v50 = vsub.f32 %v3211_v59, %v3224_v1 }
 0x29a   : > { %v1045_v6 = vpop.xlane.xlu0 %1044  ;;  %v1059_v7 = vpop.xlane.xlu1 %1058  ;;  %2581 = vpow2.f32 %v1118_v53 }
 0x29b   : > { %v3237_v9 = vmax.f32 %v3226_v2, %v1045_v6  ;;  %v3240_v10 = vmax.f32 %v3228_v3, %v1059_v7  ;;  %2583 = vpow2.f32 %v1106_v45  ;;  %v1126_v62 = vmul.f32 1.442695, %v1099_v50 }
 0x29c   : > { %2585 = vpow2.f32 %v1114_v56 }
 0x29d   : > { %1676 = vst.msk [vmem:[#allocation2 + $0x10] sm:$0xff] %vm1352_vm4, %v3237_v9  ;;  %1683 = vst.msk [vmem:[#allocation2 + $0x48] sm:$0xff] %vm1352_vm4, %v3240_v10  ;;  %1188 = vperm.xlu1 %2559, %v3207_v57   ;;  %v1090_v60 = vsub.f32 %v3226_v2, %v3237_v9  ;;  %v1094_v2 = vsub.f32 %v3167_v37, %v3175_v42  ;;  %2587 = vpow2.f32 %v1126_v62 }
 0x29e   : > { %v1071_v27 = vpop.xlane.xlu1 %1070  ;;  %v1065_v31 = vpop.xlane.xlu0 %1064 }
 0x29f   : > { %v3255_v35 = vmax.f32 %v3242_v11, %v1071_v27  ;;  %v3258_v39 = vmax.f32 %v3244_v12, %v1065_v31  ;;  %v1108_v59 = vmul.f32 1.442695, %v1090_v60  ;;  %v1116_v6 = vmul.f32 1.442695, %v1094_v2 }
 0x2a1   : > { %v1103_v46 = vsub.f32 %v3242_v11, %v3255_v35  ;;  %1689 = vst.msk [vmem:[#allocation2 + $0x78] sm:$0xff] %vm1352_vm4, %v3255_v35  ;;  %1178 = vperm.xlu1 %2559, %v3221_v0   ;;  %1686 = vst.msk [vmem:[#allocation2 + $0x60] sm:$0xff] %vm1352_vm4, %v3258_v39  ;;  %2589 = vpow2.f32 %v1108_v59  ;;  %v1100_v13 = vsub.f32 %v3244_v12, %v3258_v39 }
 0x2a2   : > { %v1067_v49 = vpop.xlane.xlu1 %1066  ;;  %v1069_v51 = vpop.xlane.xlu0 %1068  ;;  %2591 = vpow2.f32 %v1112_v4 }
 0x2a3   : > { %v1085_v54 = vmax.f32 %v1037_v40, %v1067_v49  ;;  %v3275_v55 = vmax.f32 %v3260_v41, %v1069_v51 }
 0x2a5   : > { %1687 = vst.msk [vmem:[#allocation2 + $0x68] sm:$0xff] %vm1352_vm4, %v1085_v54  ;;  %1193 = vperm.xlu1 %2559, %v3224_v1   ;;  %1203 = vperm.xlu0 %2558, %v1085_v54   ;;  %v1102_v34 = vsub.f32 %v3260_v41, %v3275_v55  ;;  %1688 = vst.msk [vmem:[#allocation2 + $0x70] sm:$0xff] %vm1352_vm4, %v3275_v55  ;;  %v1097_v1 = vsub.f32 %v3228_v3, %v3240_v10  ;;  %v1134_v41 = vmul.f32 1.442695, %v1103_v46 }
 0x2a6   : > { %v1101_v38 = vsub.f32 %v1037_v40, %v1085_v54  ;;  %v3300_v43 = vpop.eup %2579  ;;  %v1098_v3 = vsub.f32 %v3197_v52, %v3207_v57 }
 0x2a7   : > { %v1122_v5 = vmul.f32 1.442695, %v1097_v1  ;;  %v3306_v8 = vpop.eup %2581 }
 0x2a8   : > { %v1130_v7 = vmul.f32 1.442695, %v1101_v38  ;;  %v3310_v37 = vpop.eup %2583  ;;  %v1124_v42 = vmul.f32 1.442695, %v1098_v3 }
 0x2a9   : > { %1183 = vperm.xlu1 %2559, %v3240_v10   ;;  %1213 = vperm.xlu0 %2558, %v3255_v35   ;;  %2593 = vpow2.f32 %v1122_v5  ;;  %v3314_v10 = vpop.eup %2585  ;;  %v1304_v35 = vld [vmem:[#allocation3] sm:$0xff] }
 0x2aa   : > { %2595 = vpow2.f32 %v1116_v6  ;;  %v3318_v52 = vpop.eup %2587 }
 0x2ab   : > { %2597 = vpow2.f32 %v1130_v7 }
 0x2ac   : > { %2599 = vpow2.f32 %v1124_v42 }
 0x2ad   : > { %1148 = vperm.xlu1 %2559, %v3237_v9   ;;  %1387 = vperm.xlu0 %2558, %v3292_v63   ;;  %v1096_v9 = vsub.f32 %v3209_v58, %v3221_v0  ;;  %v1128_v0 = vmul.f32 1.442695, %v1100_v13 }
 0x2ae   : > { %v3322_v27 = vpop.eup %2589 }
 0x2af   : > { %v1120_v57 = vmul.f32 1.442695, %v1096_v9  ;;  %v3326_v58 = vpop.eup %2591 }
 0x2b1   : > { %1198 = vperm.xlu1 %2559, %v3258_v39   ;;  %1402 = vperm.xlu0 %2558, %v3300_v43   ;;  %2601 = vpow2.f32 %v1120_v57 }
 0x2b2   : > { %2603 = vpow2.f32 %v1128_v0 }
 0x2b5   : > { %1208 = vperm.xlu1 %2559, %v3275_v55   ;;  %1422 = vperm.xlu0 %2558, %v3306_v8  }
 0x2b6   : > { %v3328_v31 = vpop.eup %2593 }
 0x2b7   : > { %v3332_v32 = vpop.eup %2595 }
 0x2b8   : > { %v3334_v12 = vpop.eup %2597 }
 0x2b9   : > { %1392 = vperm.xlu1 %2559, %v3310_v37   ;;  %1412 = vperm.xlu0 %2558, %v3314_v10   ;;  %v3338_v33 = vpop.eup %2599 }
 0x2bd   : > { %1397 = vperm.xlu1 %2559, %v3322_v27   ;;  %1442 = vperm.xlu0 %2558, %v3318_v52  }
 0x2be   : > { %v3341_v39 = vpop.eup %2601 }
 0x2bf   : > { %v3344_v40 = vpop.eup %2603 }
 0x2c1   : > { %1407 = vperm.xlu1 %2559, %v3326_v58   ;;  %1432 = vperm.xlu0 %2558, %v3328_v31  }
 0x2c5   : > { %1417 = vperm.xlu1 %2559, %v3332_v32   ;;  %1452 = vperm.xlu0 %2558, %v3334_v12  }
 0x2c9   : > { %1437 = vperm.xlu1 %2559, %v3338_v33  }
 0x2cd   : > { %1427 = vperm.xlu1 %2559, %v3341_v39  }
 0x2d1   : > { %1447 = vperm.xlu1 %2559, %v3344_v40  }
 0x308   : > { %v1159_v44 = vpop.permute.xlu0 %1158  ;;  %v1169_v47 = vpop.permute.xlu1 %1168 }
 0x309   : > { %v1220_v54 = vsub.f32 %v3119_v19, %v1159_v44  ;;  %v1222_v62 = vsub.f32 %v3117_v18, %v1169_v47 }
 0x30b   : > { %v1240_v59 = vmul.f32 1.442695, %v1220_v54  ;;  %v1244_v19 = vmul.f32 1.442695, %v1222_v62 }
 0x30c   : > { %v1144_v48 = vpop.permute.xlu0 %1143  ;;  %v1139_v49 = vpop.permute.xlu1 %1138 }
 0x30d   : > { %v1217_v51 = vsub.f32 %v3114_v17, %v1144_v48  ;;  %v1216_v53 = vsub.f32 %v3109_v15, %v1139_v49 }
 0x30f   : > { %v1234_v36 = vmul.f32 1.442695, %v1217_v51  ;;  %v1232_v45 = vmul.f32 1.442695, %v1216_v53 }
 0x310   : > { %v1154_v50 = vpop.permute.xlu0 %1153  ;;  %v1174_v56 = vpop.permute.xlu1 %1173 }
 0x311   : > { %2605 = vpow2.f32 %v1234_v36  ;;  %v1219_v60 = vsub.f32 %v3112_v16, %v1154_v50  ;;  %v1223_v61 = vsub.f32 %v3123_v20, %v1174_v56 }
 0x312   : > { %2607 = vpow2.f32 %v1232_v45 }
 0x313   : > { %v1238_v1 = vmul.f32 1.442695, %v1219_v60  ;;  %v1246_v2 = vmul.f32 1.442695, %v1223_v61 }
 0x314   : > { %v1164_v17 = vpop.permute.xlu1 %1163 }
 0x315   : > { %2609 = vpow2.f32 %v1238_v1  ;;  %v1221_v15 = vsub.f32 %v3125_v21, %v1164_v17 }
 0x316   : > { %2611 = vpow2.f32 %v1240_v59 }
 0x317   : > { %v1242_v4 = vmul.f32 1.442695, %v1221_v15  ;;  %2613 = vpow2.f32 %v1246_v2 }
 0x318   : > { %v1189_v5 = vpop.permute.xlu1 %1188 }
 0x319   : > { %2615 = vpow2.f32 %v1242_v4  ;;  %v1226_v9 = vsub.f32 %v3129_v22, %v1189_v5 }
 0x31a   : > { %2617 = vpow2.f32 %v1244_v19 }
 0x31c   : > { %v1179_v16 = vpop.permute.xlu1 %1178 }
 0x31d   : > { %v1224_v7 = vsub.f32 %v3131_v23, %v1179_v16 }
 0x31e   : > { %v3354_v38 = vpop.eup %2605 }
 0x31f   : > { %v2608_v20 = vpop.eup %2607  ;;  %v1248_v48 = vmul.f32 1.442695, %v1224_v7 }
 0x320   : > { %1272 = vadd.xlane.f32.xlu1 %v2608_v20  ;;  %v1204_v18 = vpop.permute.xlu0 %1203  ;;  %v1194_v6 = vpop.permute.xlu1 %1193  ;;  %v1264_v3 = vpack.c.bf16 %v3354_v38, %v2608_v20 }
 0x321   : > { %v1227_v21 = vsub.f32 %v3135_v24, %v1194_v6  ;;  %v1252_v24 = vmul.f32 1.442695, %v1226_v9  ;;  %v1229_v22 = vsub.f32 %v3151_v30, %v1204_v18  ;;  %v1132_v6 = vmul.f32 1.442695, %v1102_v34 }
 0x322   : > { %v2610_v42 = vpop.eup %2609  ;;  %2370 = vmatprep.mubr.bf16.mxu0 %v1264_v3 }
 0x323   : > { %v1254_v57 = vmul.f32 1.442695, %v1227_v21  ;;  %v3360_v13 = vpop.eup %2611 }
 0x324   : > { %1278 = vadd.xlane.f32.xlu1 %v2610_v42  ;;  %v1214_v0 = vpop.permute.xlu0 %1213  ;;  %v1184_v44 = vpop.permute.xlu1 %1183 }
 0x325   : > { %v2614_v47 = vpop.eup %2613  ;;  %v1225_v49 = vsub.f32 %v3137_v25, %v1184_v44  ;;  %2619 = vpow2.f32 %v1254_v57  ;;  %v1231_v23 = vsub.f32 %v3147_v29, %v1214_v0  ;;  %v1258_v29 = vmul.f32 1.442695, %v1229_v22 }
 0x326   : > { %v2616_v51 = vpop.eup %2615  ;;  %2621 = vpow2.f32 %v1248_v48  ;;  %v1320_v48 = vmul.f32 %v3292_v63, %v1304_v35 }
 0x327   : > { %v2618_v53 = vpop.eup %2617  ;;  %v1250_v54 = vmul.f32 1.442695, %v1225_v49  ;;  %v1266_v36 = vpack.c.bf16 %v2616_v51, %v3360_v13  ;;  %v1262_v60 = vmul.f32 1.442695, %v1231_v23 }
 0x328   : > { %1286 = vadd.xlane.f32.xlu1 %v2614_v47  ;;  %v1149_v45 = vpop.permute.xlu1 %1148  ;;  %v1267_v50 = vpack.c.bf16 %v2614_v47, %v2618_v53  ;;  %v3390_v0 = vpop.permute.xlu0 %1387 }
 0x329   : > { %v1218_v56 = vsub.f32 %v3107_v14, %v1149_v45  ;;  %2374 = vmatprep.mubr.bf16.mxu1 %v1266_v36  ;;  %2623 = vpow2.f32 %v1250_v54  ;;  %v1311_v54 = vld [vmem:[#allocation3 + $0x38] sm:$0xff] }
 0x32a   : > { %2375 = vmatmul.mubr.bf16.vlgmr.msra.gmra.mxu1 %v1267_v50  ;;  %2625 = vpow2.f32 %v1252_v24  ;;  %v1327_v45 = vmul.f32 %v3306_v8, %v1311_v54  ;;  %v1313_v8 = vld [vmem:[#allocation3 + $0x48] sm:$0xff]  ;;  %v1312_v54 = vld [vmem:[#allocation3 + $0x40] sm:$0xff] }
 0x32b   : > { %v1236_v25 = vmul.f32 1.442695, %v1218_v56  ;;  %v1309_v56 = vld [vmem:[#allocation3 + $0x28] sm:$0xff] }
 0x32c   : > { %1282 = vadd.xlane.f32.xlu1 %v2616_v51  ;;  %v1199_v61 = vpop.permute.xlu1 %1198  ;;  %v3394_v47 = vpop.permute.xlu0 %1402  ;;  %v1307_v51 = vld [vmem:[#allocation3 + $0x18] sm:$0xff] }
 0x32d   : > { %2627 = vpow2.f32 %v1236_v25  ;;  %v1228_v62 = vsub.f32 %v3143_v28, %v1199_v61  ;;  %v1325_v25 = vmul.f32 %v3314_v10, %v1309_v56  ;;  %v1315_v61 = vld [vmem:[#allocation3 + $0x58] sm:$0xff] }
 0x32e   : > { %2629 = vpow2.f32 %v1262_v60 }
 0x32f   : > { %v1256_v30 = vmul.f32 1.442695, %v1228_v62  ;;  %2631 = vpow2.f32 %v1258_v29 }
 0x330   : > { %v1209_v59 = vpop.permute.xlu1 %1208  ;;  %v3398_v46 = vpop.permute.xlu0 %1422 }
 0x331   : > { %2633 = vpow2.f32 %v1256_v30  ;;  %v1230_v1 = vsub.f32 %v3141_v26, %v1209_v59  ;;  %v1331_v30 = vmul.f32 %v3318_v52, %v1315_v61  ;;  %v1305_v52 = vld [vmem:[#allocation3 + $0x8] sm:$0xff] }
 0x332   : > { %v2620_v14 = vpop.eup %2619 }
 0x333   : > { %v1260_v2 = vmul.f32 1.442695, %v1230_v1  ;;  %1294 = vadd.xlane.f32.xlu1 %v2620_v14  ;;  %v2622_v17 = vpop.eup %2621 }
 0x334   : > { %v3380_v34 = vpop.permute.xlu1 %1392  ;;  %v3403_v36 = vpop.permute.xlu0 %1412 }
 0x335   : > { %2635 = vpow2.f32 %v1260_v2  ;;  %v1329_v2 = vmul.f32 %v3328_v31, %v1313_v8  ;;  %v1376_v8 = vld [vmem:[#allocation4 + $0x38] sm:$0xff] }
 0x336   : > { %v2624_v15 = vpop.eup %2623  ;;  %2637 = vpow2.f32 %v1132_v6  ;;  %v1321_v6 = vmul.f32 %v3310_v37, %v1305_v52  ;;  %v1371_v52 = vld [vmem:[#allocation4 + $0x10] sm:$0xff] }
 0x337   : > { %v2626_v19 = vpop.eup %2625  ;;  %1290 = vadd.xlane.f32.xlu1 %v2624_v15  ;;  %v1268_v4 = vpack.c.bf16 %v2624_v15, %v2622_v17  ;;  %2639 = vpow2.f32 %v1134_v41  ;;  %v1319_v15 = vld [vmem:[#allocation3 + $0x78] sm:$0xff] }
 0x338   : > { %v1269_v5 = vpack.c.bf16 %v2620_v14, %v2626_v19  ;;  %v3407_v63 = vpop.permute.xlu0 %1442 }
 0x339   : > { %2378 = vmatprep.mubr.bf16.mxu1 %v1268_v4 }
 0x33a   : > { %v2628_v16 = vpop.eup %2627  ;;  %2379 = vmatmul.mubr.bf16.gmra.mxu1 %v1269_v5 }
 0x33b   : > { %v2630_v28 = vpop.eup %2629  ;;  %1276 = vadd.xlane.f32.xlu0 %v2628_v16  ;;  %v1265_v20 = vpack.c.bf16 %v2610_v42, %v2628_v16 }
 0x33c   : > { %1302 = vadd.xlane.f32.xlu1 %v2630_v28  ;;  %v2632_v18 = vpop.eup %2631  ;;  %v3412_v62 = vpop.permute.xlu0 %1432 }
 0x33d   : > { %2371 = vmatmul.mubr.bf16.vlgmr.msra.gmra.mxu0 %v1265_v20 }
 0x33e   : > { %v2634_v26 = vpop.eup %2633 }
 0x33f   : > { %1274 = vadd.xlane.f32.xlu0 %v3354_v38  ;;  %v1270_v3 = vpack.c.bf16 %v2632_v18, %v2634_v26  ;;  %v3382_v38 = vpop.permute.xlu1 %1397 }
 0x340   : > { %1298 = vadd.xlane.f32.xlu1 %v2632_v18  ;;  %v3415_v14 = vpop.permute.xlu0 %1452  ;;  %v1317_v18 = vld [vmem:[#allocation3 + $0x68] sm:$0xff] }
 0x341   : > { %2382 = vmatprep.mubr.bf16.mxu1 %v1270_v3  ;;  %v1333_v3 = vmul.f32 %v3334_v12, %v1317_v18  ;;  %v1380_v18 = vld [vmem:[#allocation4 + $0x58] sm:$0xff] }
 0x342   : > { %v2636_v7 = vpop.eup %2635 }
 0x343   : > { %1284 = vadd.xlane.f32.xlu0 %v2618_v53  ;;  %v1271_v21 = vpack.c.bf16 %v2630_v28, %v2636_v7  ;;  %v3374_v42 = vpop.eup %2637  ;;  %v3384_v9 = vpop.permute.xlu1 %1407  ;;  %v1323_v53 = vmul.f32 %v3300_v43, %v1307_v51 }
 0x344   : > { %v2640_v55 = vpop.eup %2639 }
 0x345   : > { %2383 = vmatmul.mubr.bf16.gmra.mxu1 %v1271_v21  ;;  %v1335_v16 = vmul.f32 %v2640_v55, %v1319_v15  ;;  %v1472_v15 = vmul.f32 %v3398_v46, %v1376_v8 }
 0x347   : > { %1280 = vadd.xlane.f32.xlu0 %v3360_v13  ;;  %v3386_v57 = vpop.permute.xlu1 %1417 }
 0x34b   : > { %1292 = vadd.xlane.f32.xlu0 %v2626_v19  ;;  %v3388_v13 = vpop.permute.xlu1 %1437 }
 0x34f   : > { %1288 = vadd.xlane.f32.xlu0 %v2622_v17  ;;  %v3392_v44 = vpop.permute.xlu1 %1427  ;;  %v1306_v17 = vld [vmem:[#allocation3 + $0x10] sm:$0xff] }
 0x350   : > { %v1322_v4 = vmul.f32 %v3322_v27, %v1306_v17  ;;  %v1374_v17 = vld [vmem:[#allocation4 + $0x28] sm:$0xff] }
 0x351   : > { %1457 = vperm.xlu1 %2559, %v3374_v42  }
 0x353   : > { %1300 = vadd.xlane.f32.xlu0 %v2636_v7  ;;  %v3396_v11 = vpop.permute.xlu1 %1447  ;;  %v1310_v7 = vld [vmem:[#allocation3 + $0x30] sm:$0xff] }
 0x357   : > { %1296 = vadd.xlane.f32.xlu0 %v2634_v26 }
 0x36d   : > { %1462 = vperm.xlu0 %2558, %v2640_v55   ;;  %v1326_v55 = vmul.f32 %v3332_v32, %v1310_v7  ;;  %v1328_v32 = vmul.f32 %v3341_v39, %v1312_v54  ;;  %v1373_v39 = vld [vmem:[#allocation4 + $0x20] sm:$0xff]  ;;  %v1378_v7 = vld [vmem:[#allocation4 + $0x48] sm:$0xff] }
 0x3a9   : > { %v1273_v49 = vpop.xlane.xlu1 %1272 }
 0x3aa   : > { %v1336_v23 = vadd.f32 %v1320_v48, %v1273_v49  ;;  %v1308_v48 = vld [vmem:[#allocation3 + $0x20] sm:$0xff] }
 0x3ab   : > { %v1324_v37 = vmul.f32 %v3326_v58, %v1308_v48  ;;  %v1370_v48 = vld [vmem:[#allocation4 + $0x8] sm:$0xff] }
 0x3ac   : > { %1353 = vst.msk [vmem:[#allocation3] sm:$0xff] %vm1352_vm4, %v1336_v23  ;;  %v1314_v23 = vld [vmem:[#allocation3 + $0x50] sm:$0xff] }
 0x3ad   : > { %v1279_v24 = vpop.xlane.xlu1 %1278 }
 0x3ae   : > { %v1339_v22 = vadd.f32 %v1323_v53, %v1279_v24  ;;  %v1330_v53 = vmul.f32 %v3338_v33, %v1314_v23 }
 0x3b0   : > { %1356 = vst.msk [vmem:[#allocation3 + $0x18] sm:$0xff] %vm1352_vm4, %v1339_v22 }
 0x3b1   : > { %v1287_v50 = vpop.xlane.xlu1 %1286 }
 0x3b2   : > { %v1343_v60 = vadd.f32 %v1327_v45, %v1287_v50  ;;  %v1318_v50 = vld [vmem:[#allocation3 + $0x70] sm:$0xff] }
 0x3b3   : > { %v1334_v58 = vmul.f32 %v3374_v42, %v1318_v50  ;;  %v1384_v50 = vld [vmem:[#allocation4 + $0x78] sm:$0xff] }
 0x3b4   : > { %1360 = vst.msk [vmem:[#allocation3 + $0x38] sm:$0xff] %vm1352_vm4, %v1343_v60 }
 0x3b5   : > { %v1283_v29 = vpop.xlane.xlu1 %1282 }
 0x3b6   : > { %v1341_v43 = vadd.f32 %v1325_v25, %v1283_v29  ;;  %v1316_v25 = vld [vmem:[#allocation3 + $0x60] sm:$0xff] }
 0x3b7   : > { %v1332_v33 = vmul.f32 %v3344_v40, %v1316_v25  ;;  %v1382_v25 = vld [vmem:[#allocation4 + $0x68] sm:$0xff] }
 0x3b8   : > { %1358 = vst.msk [vmem:[#allocation3 + $0x28] sm:$0xff] %vm1352_vm4, %v1341_v43 }
 0x3bc   : > { %v1295_v59 = vpop.xlane.xlu1 %1294 }
 0x3bd   : > { %v1347_v1 = vadd.f32 %v1331_v30, %v1295_v59  ;;  %v1375_v30 = vld [vmem:[#allocation4 + $0x30] sm:$0xff] }
 0x3be   : > { %v1471_v59 = vmul.f32 %v3386_v57, %v1375_v30  ;;  %v1478_v30 = vmul.f32 %v3415_v14, %v1382_v25 }
 0x3bf   : > { %1364 = vst.msk [vmem:[#allocation3 + $0x58] sm:$0xff] %vm1352_vm4, %v1347_v1 }
 0x3c0   : > { %v1291_v10 = vpop.xlane.xlu1 %1290 }
 0x3c1   : > { %v1345_v19 = vadd.f32 %v1329_v2, %v1291_v10  ;;  %v1469_v2 = vmul.f32 %v3384_v9, %v1373_v39  ;;  %v1379_v9 = vld [vmem:[#allocation4 + $0x50] sm:$0xff] }
 0x3c2   : > { %v1475_v46 = vmul.f32 %v3388_v13, %v1379_v9 }
 0x3c3   : > { %1362 = vst.msk [vmem:[#allocation3 + $0x48] sm:$0xff] %vm1352_vm4, %v1345_v19 }
 0x3c4   : > { %v1277_v5 = vpop.xlane.xlu0 %1276 }
 0x3c5   : > { %v1338_v28 = vadd.f32 %v1322_v4, %v1277_v5  ;;  %v1303_v20 = vpop.xlane.xlu1 %1302  ;;  %v1470_v4 = vmul.f32 %v3403_v36, %v1374_v17 }
 0x3c6   : > { %v1351_v26 = vadd.f32 %v1335_v16, %v1303_v20  ;;  %v1369_v20 = vld [vmem:[#allocation4] sm:$0xff] }
 0x3c7   : > { %1355 = vst.msk [vmem:[#allocation3 + $0x10] sm:$0xff] %vm1352_vm4, %v1338_v28  ;;  %v1377_v28 = vld [vmem:[#allocation4 + $0x40] sm:$0xff] }
 0x3c8   : > { %1368 = vst.msk [vmem:[#allocation3 + $0x78] sm:$0xff] %vm1352_vm4, %v1351_v26  ;;  %v1275_v31 = vpop.xlane.xlu0 %1274  ;;  %v1473_v36 = vmul.f32 %v3392_v44, %v1377_v28  ;;  %v1474_v44 = vmul.f32 %v3412_v62, %v1378_v7 }
 0x3c9   : > { %v1337_v27 = vadd.f32 %v1321_v6, %v1275_v31  ;;  %v1299_v21 = vpop.xlane.xlu1 %1298  ;;  %v1467_v6 = vmul.f32 %v3382_v38, %v1371_v52 }
 0x3ca   : > { %v1349_v41 = vadd.f32 %v1333_v3, %v1299_v21  ;;  %v1372_v3 = vld [vmem:[#allocation4 + $0x18] sm:$0xff] }
 0x3cb   : > { %1354 = vst.msk [vmem:[#allocation3 + $0x8] sm:$0xff] %vm1352_vm4, %v1337_v27  ;;  %v1468_v38 = vmul.f32 %v3394_v47, %v1372_v3 }
 0x3cc   : > { %1366 = vst.msk [vmem:[#allocation3 + $0x68] sm:$0xff] %vm1352_vm4, %v1349_v41  ;;  %v1285_v35 = vpop.xlane.xlu0 %1284  ;;  %v1465_v41 = vmul.f32 %v3390_v0, %v1369_v20 }
 0x3cd   : > { %v1342_v49 = vadd.f32 %v1326_v55, %v1285_v35  ;;  %v1476_v55 = vmul.f32 %v3407_v63, %v1380_v18 }
 0x3cf   : > { %1359 = vst.msk [vmem:[#allocation3 + $0x30] sm:$0xff] %vm1352_vm4, %v1342_v49 }
 0x3d0   : > { %v1281_v51 = vpop.xlane.xlu0 %1280 }
 0x3d1   : > { %v1340_v12 = vadd.f32 %v1324_v37, %v1281_v51  ;;  %v1458_v51 = vpop.permute.xlu1 %1457 }
 0x3d3   : > { %1357 = vst.msk [vmem:[#allocation3 + $0x20] sm:$0xff] %vm1352_vm4, %v1340_v12  ;;  %v1383_v12 = vld [vmem:[#allocation4 + $0x70] sm:$0xff] }
 0x3d4   : > { %v1293_v24 = vpop.xlane.xlu0 %1292 }
 0x3d5   : > { %v1346_v22 = vadd.f32 %v1330_v53, %v1293_v24  ;;  %v1466_v24 = vmul.f32 %v3380_v34, %v1370_v48 }
 0x3d7   : > { %1363 = vst.msk [vmem:[#allocation3 + $0x50] sm:$0xff] %vm1352_vm4, %v1346_v22  ;;  %v1381_v22 = vld [vmem:[#allocation4 + $0x60] sm:$0xff] }
 0x3d8   : > { %v1289_v45 = vpop.xlane.xlu0 %1288 }
 0x3d9   : > { %v1344_v56 = vadd.f32 %v1328_v32, %v1289_v45  ;;  %v1479_v32 = vmul.f32 %v1458_v51, %v1383_v12 }
 0x3db   : > { %1361 = vst.msk [vmem:[#allocation3 + $0x40] sm:$0xff] %vm1352_vm4, %v1344_v56 }
 0x3dc   : > { %v1301_v60 = vpop.xlane.xlu0 %1300 }
 0x3dd   : > { %v1350_v29 = vadd.f32 %v1334_v58, %v1301_v60  ;;  %v1477_v60 = vmul.f32 %v3396_v11, %v1381_v22 }
 0x3df   : > { %1367 = vst.msk [vmem:[#allocation3 + $0x70] sm:$0xff] %vm1352_vm4, %v1350_v29 }
 0x3e0   : > { %v1297_v43 = vpop.xlane.xlu0 %1296 }
 0x3e1   : > { %v1348_v61 = vadd.f32 %v1332_v33, %v1297_v43 }
 0x3e3   : > { %1365 = vst.msk [vmem:[#allocation3 + $0x60] sm:$0xff] %vm1352_vm4, %v1348_v61 }
 0x3e8   : > { %v1463_v56 = vpop.permute.xlu0 %1462 }
 0x3e9   : > { %v1480_v33 = vmul.f32 %v1463_v56, %v1384_v50 }
 0x3ea   : > { %v2376_v1 = vpop.f32.mrf.mxu1 }
 0x3eb   : > { %v1648_v42 = vadd.f32 %v2376_v1, %v1471_v59 }
 0x3ec   : > { %v1595_v10 = vpop.f32.mrf.mxu1 }
 0x3ed   : > { %1664 = vst.msk [vmem:[#allocation4 + $0x30] sm:$0xff] %vm902_vm3, %v1648_v42  ;;  %v1646_v40 = vadd.f32 %v1595_v10, %v1469_v2 }
 0x3ee   : > { %v2377_v19 = vpop.f32.mrf.mxu1 }
 0x3ef   : > { %1662 = vst.msk [vmem:[#allocation4 + $0x20] sm:$0xff] %vm902_vm3, %v1646_v40  ;;  %v1649_v5 = vadd.f32 %v2377_v19, %v1472_v15 }
 0x3f0   : > { %v1598_v16 = vpop.f32.mrf.mxu1 }
 0x3f1   : > { %1665 = vst.msk [vmem:[#allocation4 + $0x38] sm:$0xff] %vm902_vm3, %v1649_v5  ;;  %v1647_v57 = vadd.f32 %v1598_v16, %v1470_v4 }
 0x3f3   : > { %1663 = vst.msk [vmem:[#allocation4 + $0x28] sm:$0xff] %vm902_vm3, %v1647_v57 }
 0x3fa   : > { %v2380_v26 = vpop.f32.mrf.mxu1 }
 0x3fb   : > { %v1652_v31 = vadd.f32 %v2380_v26, %v1475_v46 }
 0x3fc   : > { %v1611_v27 = vpop.f32.mrf.mxu1 }
 0x3fd   : > { %v2372_v21 = vpop.f32.mrf.mxu0  ;;  %1668 = vst.msk [vmem:[#allocation4 + $0x50] sm:$0xff] %vm902_vm3, %v1652_v31  ;;  %v1650_v35 = vadd.f32 %v1611_v27, %v1473_v36 }
 0x3fe   : > { %v1644_v13 = vadd.f32 %v2372_v21, %v1467_v6  ;;  %v2381_v49 = vpop.f32.mrf.mxu1 }
 0x3ff   : > { %v1579_v37 = vpop.f32.mrf.mxu0  ;;  %1666 = vst.msk [vmem:[#allocation4 + $0x40] sm:$0xff] %vm902_vm3, %v1650_v35  ;;  %v1653_v23 = vadd.f32 %v2381_v49, %v1476_v55 }
 0x400   : > { %1660 = vst.msk [vmem:[#allocation4 + $0x10] sm:$0xff] %vm902_vm3, %v1644_v13  ;;  %v1642_v0 = vadd.f32 %v1579_v37, %v1465_v41  ;;  %v1614_v63 = vpop.f32.mrf.mxu1 }
 0x401   : > { %v2373_v53 = vpop.f32.mrf.mxu0  ;;  %1669 = vst.msk [vmem:[#allocation4 + $0x58] sm:$0xff] %vm902_vm3, %v1653_v23  ;;  %v1651_v54 = vadd.f32 %v1614_v63, %v1474_v44 }
 0x402   : > { %1658 = vst.msk [vmem:[#allocation4] sm:$0xff] %vm902_vm3, %v1642_v0  ;;  %v1645_v47 = vadd.f32 %v2373_v53, %v1468_v38 }
 0x403   : > { %v1582_v62 = vpop.f32.mrf.mxu0  ;;  %1667 = vst.msk [vmem:[#allocation4 + $0x48] sm:$0xff] %vm902_vm3, %v1651_v54 }
 0x404   : > { %1661 = vst.msk [vmem:[#allocation4 + $0x18] sm:$0xff] %vm902_vm3, %v1645_v47  ;;  %v1643_v45 = vadd.f32 %v1582_v62, %v1466_v24 }
 0x405   : > { %v2384_v58 = vpop.f32.mrf.mxu1 }
 0x406   : > { %1659 = vst.msk [vmem:[#allocation4 + $0x8] sm:$0xff] %vm902_vm3, %v1643_v45  ;;  %v1656_v34 = vadd.f32 %v2384_v58, %v1479_v32 }
 0x407   : > { %v1627_v29 = vpop.f32.mrf.mxu1 }
 0x408   : > { %1672 = vst.msk [vmem:[#allocation4 + $0x70] sm:$0xff] %vm902_vm3, %v1656_v34  ;;  %v1654_v43 = vadd.f32 %v1627_v29, %v1477_v60 }
 0x409   : > { %v2385_v61 = vpop.f32.mrf.mxu1 }
 0x40a   : > { %1670 = vst.msk [vmem:[#allocation4 + $0x60] sm:$0xff] %vm902_vm3, %v1654_v43  ;;  %v1657_v39 = vadd.f32 %v2385_v61, %v1480_v33  ;;  %1693 = sbr.rel (%p2226_p9) target bundleno = 1445 (0x5a5), region = 139 }
 0x40b   : > { %v1630_v59 = vpop.f32.mrf.mxu1 }
 0x40c   : > { %1673 = vst.msk [vmem:[#allocation4 + $0x78] sm:$0xff] %vm902_vm3, %v1657_v39  ;;  %v1655_v8 = vadd.f32 %v1630_v59, %v1478_v30 }
 0x40e   : > { %1671 = vst.msk [vmem:[#allocation4 + $0x68] sm:$0xff] %vm902_vm3, %v1655_v8 }
 0x40f   : > { %v1725_v11 = vld [vmem:[#allocation3 + $0x78] sm:$0xff]  ;;  %v1723_v1 = vld [vmem:[#allocation3 + $0x68] sm:$0xff]  ;;  %v2804_v2 = vmov 0   ;;  %v1724_v14 = vld [vmem:[#allocation3 + $0x70] sm:$0xff] }
 0x410   : > { %2642 = vset.pattern.permute.xlu1 %v2804_v2  ;;  %2641 = vset.pattern.permute.xlu0 %v2804_v2  ;;  %v1722_v42 = vld [vmem:[#allocation3 + $0x60] sm:$0xff]  ;;  %v1721_v17 = vld [vmem:[#allocation3 + $0x58] sm:$0xff]  ;;  %v1720_v10 = vld [vmem:[#allocation3 + $0x50] sm:$0xff] }
 0x411   : > { %1803 = vperm.xlu0 %2641, %v1725_v11   ;;  %1793 = vperm.xlu1 %2642, %v1723_v1   ;;  %v1719_v15 = vld [vmem:[#allocation3 + $0x48] sm:$0xff]  ;;  %v1718_v40 = vld [vmem:[#allocation3 + $0x40] sm:$0xff]  ;;  %v1717_v19 = vld [vmem:[#allocation3 + $0x38] sm:$0xff] }
 0x412   : > { %v1716_v4 = vld [vmem:[#allocation3 + $0x30] sm:$0xff]  ;;  %v1715_v5 = vld [vmem:[#allocation3 + $0x28] sm:$0xff]  ;;  %v1714_v16 = vld [vmem:[#allocation3 + $0x20] sm:$0xff] }
 0x413   : > { %v1713_v57 = vld [vmem:[#allocation3 + $0x18] sm:$0xff]  ;;  %v1712_v9 = vld [vmem:[#allocation3 + $0x10] sm:$0xff]  ;;  %v1711_v52 = vld [vmem:[#allocation3 + $0x8] sm:$0xff] }
 0x414   : > { %v1710_v28 = vld [vmem:[#allocation3] sm:$0xff]  ;;  %v1841_v20 = vld [vmem:[%s3641_s5 + $0x8] sm:$0xff]  ;;  %v1709_v7 = vld [vmem:[#allocation4 + $0x78] sm:$0xff] }
 0x415   : > { %1798 = vperm.xlu0 %2641, %v1724_v14   ;;  %1788 = vperm.xlu1 %2642, %v1722_v42   ;;  %v1840_v46 = vld [vmem:[%s3640_s15] sm:$0xff]  ;;  %v1708_v35 = vld [vmem:[#allocation4 + $0x70] sm:$0xff]  ;;  %v1707_v13 = vld [vmem:[#allocation4 + $0x68] sm:$0xff] }
 0x416   : > { %v1838_v18 = vld [vmem:[%s3642_s7] sm:$0xff]  ;;  %v1705_v53 = vld [vmem:[#allocation4 + $0x58] sm:$0xff]  ;;  %v1704_v22 = vld [vmem:[#allocation4 + $0x50] sm:$0xff] }
 0x417   : > { %2418 = vmatprep.mubr.msk.f32.mxu0 %vm902_vm3, %v1838_v18  ;;  %v1706_v23 = vld [vmem:[#allocation4 + $0x60] sm:$0xff]  ;;  %v1703_v50 = vld [vmem:[#allocation4 + $0x48] sm:$0xff]  ;;  %v1701_v43 = vld [vmem:[#allocation4 + $0x38] sm:$0xff] }
 0x418   : > { %v1702_v34 = vld [vmem:[#allocation4 + $0x40] sm:$0xff]  ;;  %v1700_v59 = vld [vmem:[#allocation4 + $0x30] sm:$0xff]  ;;  %v1699_v2 = vld [vmem:[#allocation4 + $0x28] sm:$0xff] }
 0x419   : > { %1783 = vperm.xlu0 %2641, %v1721_v17   ;;  %1778 = vperm.xlu1 %2642, %v1720_v10   ;;  %v1698_v10 = vld [vmem:[#allocation4 + $0x20] sm:$0xff] }
 0x41d   : > { %1773 = vperm.xlu0 %2641, %v1719_v15   ;;  %1768 = vperm.xlu1 %2642, %v1718_v40  }
 0x421   : > { %1763 = vperm.xlu0 %2641, %v1717_v19   ;;  %1758 = vperm.xlu1 %2642, %v1716_v4   ;;  %v1697_v19 = vld [vmem:[#allocation4 + $0x18] sm:$0xff] }
 0x425   : > { %1753 = vperm.xlu0 %2641, %v1715_v5   ;;  %1748 = vperm.xlu1 %2642, %v1714_v16   ;;  %v1696_v16 = vld [vmem:[#allocation4 + $0x10] sm:$0xff] }
 0x429   : > { %1743 = vperm.xlu0 %2641, %v1713_v57   ;;  %1738 = vperm.xlu1 %2642, %v1712_v9  }
 0x42d   : > { %1733 = vperm.xlu0 %2641, %v1711_v52   ;;  %1728 = vperm.xlu1 %2642, %v1710_v28   ;;  %v1695_v52 = vld [vmem:[#allocation4 + $0x8] sm:$0xff] }
 0x431   : > { %1844 = vperm.xlu0 %2641, %v1840_v46   ;;  %1849 = vperm.xlu1 %2642, %v1841_v20   ;;  %v1694_v20 = vld [vmem:[#allocation4] sm:$0xff] }
 0x48c   : > { %v1804_v26 = vpop.permute.xlu0 %1803  ;;  %v1794_v6 = vpop.permute.xlu1 %1793 }
 0x48d   : > { %2643 = vrcp.f32 %v1804_v26  ;;  %v1839_v26 = vld [vmem:[%s3642_s7 + $0x8] sm:$0xff] }
 0x48e   : > { %2645 = vrcp.f32 %v1794_v6 }
 0x490   : > { %v1799_v36 = vpop.permute.xlu0 %1798  ;;  %v1789_v31 = vpop.permute.xlu1 %1788 }
 0x491   : > { %2647 = vrcp.f32 %v1799_v36 }
 0x492   : > { %2649 = vrcp.f32 %v1789_v31  ;;  %v1982_v31 = vld [vmem:[%s438_s14 + $0x8] sm:$0xff] }
 0x494   : > { %v1784_v3 = vpop.permute.xlu0 %1783  ;;  %v1779_v21 = vpop.permute.xlu1 %1778 }
 0x495   : > { %2651 = vrcp.f32 %v1784_v3 }
 0x496   : > { %2653 = vrcp.f32 %v1779_v21  ;;  %v1981_v21 = vld [vmem:[%s438_s14] sm:$0xff] }
 0x498   : > { %v1774_v49 = vpop.permute.xlu0 %1773  ;;  %v1769_v51 = vpop.permute.xlu1 %1768 }
 0x499   : > { %2655 = vrcp.f32 %v1774_v49 }
 0x49a   : > { %v2644_v27 = vpop.eup %2643  ;;  %2657 = vrcp.f32 %v1769_v51 }
 0x49b   : > { %v1837_v41 = vmul.f32 %v2644_v27, %v1709_v7  ;;  %v2646_v55 = vpop.eup %2645 }
 0x49c   : > { %v1833_v38 = vmul.f32 %v2646_v55, %v1707_v13  ;;  %v1764_v63 = vpop.permute.xlu0 %1763  ;;  %v1759_v47 = vpop.permute.xlu1 %1758 }
 0x49d   : > { %2386 = vmatprep.subr.msk.mxu0 %vm902_vm3, %v1837_v41  ;;  %2659 = vrcp.f32 %v1764_v63 }
 0x49e   : > { %v2648_v48 = vpop.eup %2647  ;;  %2387 = vmatpush3.xpose.msk.msra.mxu0 %vm902_vm3, %v1837_v41  ;;  %2661 = vrcp.f32 %v1759_v47 }
 0x49f   : > { %v1835_v37 = vmul.f32 %v2648_v48, %v1708_v35  ;;  %v2650_v44 = vpop.eup %2649 }
 0x4a0   : > { %v1831_v0 = vmul.f32 %v2650_v44, %v1706_v23  ;;  %v1754_v45 = vpop.permute.xlu0 %1753  ;;  %v1749_v60 = vpop.permute.xlu1 %1748 }
 0x4a1   : > { %2388 = vmatprep.subr.msk.mxu0 %vm902_vm3, %v1835_v37  ;;  %2663 = vrcp.f32 %v1754_v45 }
 0x4a2   : > { %2389 = vmatpush3.xpose.msk.msra.mxu0 %vm902_vm3, %v1835_v37  ;;  %v2652_v12 = vpop.eup %2651  ;;  %2665 = vrcp.f32 %v1749_v60 }
 0x4a3   : > { %2390 = vmatprep.subr.msk.mxu0 %vm902_vm3, %v1833_v38  ;;  %v1829_v24 = vmul.f32 %v2652_v12, %v1705_v53  ;;  %v2654_v54 = vpop.eup %2653 }
 0x4a4   : > { %v1827_v62 = vmul.f32 %v2654_v54, %v1704_v22  ;;  %v1744_v33 = vpop.permute.xlu0 %1743  ;;  %v1739_v39 = vpop.permute.xlu1 %1738 }
 0x4a5   : > { %2667 = vrcp.f32 %v1744_v33 }
 0x4a6   : > { %2391 = vmatpush3.xpose.msk.msra.mxu0 %vm902_vm3, %v1833_v38  ;;  %v2656_v32 = vpop.eup %2655  ;;  %2669 = vrcp.f32 %v1739_v39 }
 0x4a7   : > { %2392 = vmatprep.subr.msk.mxu0 %vm902_vm3, %v1831_v0  ;;  %v1825_v56 = vmul.f32 %v2656_v32, %v1703_v50  ;;  %v2658_v58 = vpop.eup %2657 }
 0x4a8   : > { %v1823_v25 = vmul.f32 %v2658_v58, %v1702_v34  ;;  %v1734_v1 = vpop.permute.xlu0 %1733  ;;  %v1729_v17 = vpop.permute.xlu1 %1728 }
 0x4a9   : > { %2671 = vrcp.f32 %v1734_v1 }
 0x4aa   : > { %2393 = vmatpush3.xpose.msk.msra.mxu0 %vm902_vm3, %v1831_v0  ;;  %v2660_v29 = vpop.eup %2659  ;;  %2673 = vrcp.f32 %v1729_v17 }
 0x4ab   : > { %2394 = vmatprep.subr.msk.mxu0 %vm902_vm3, %v1829_v24  ;;  %v1821_v61 = vmul.f32 %v2660_v29, %v1701_v43  ;;  %v2662_v30 = vpop.eup %2661 }
 0x4ac   : > { %v1819_v8 = vmul.f32 %v2662_v30, %v1700_v59  ;;  %v1850_v6 = vpop.permute.xlu1 %1849  ;;  %v1845_v7 = vpop.permute.xlu0 %1844 }
 0x4ae   : > { %2395 = vmatpush3.xpose.msk.msra.mxu0 %vm902_vm3, %v1829_v24  ;;  %v2664_v11 = vpop.eup %2663 }
 0x4af   : > { %2396 = vmatprep.subr.msk.mxu0 %vm902_vm3, %v1827_v62  ;;  %v1817_v14 = vmul.f32 %v2664_v11, %v1699_v2  ;;  %v2666_v42 = vpop.eup %2665 }
 0x4b0   : > { %v1815_v15 = vmul.f32 %v2666_v42, %v1698_v10 }
 0x4b2   : > { %2397 = vmatpush3.xpose.msk.msra.mxu0 %vm902_vm3, %v1827_v62  ;;  %v2668_v40 = vpop.eup %2667 }
 0x4b3   : > { %2398 = vmatprep.subr.msk.mxu0 %vm902_vm3, %v1825_v56  ;;  %v1813_v4 = vmul.f32 %v2668_v40, %v1697_v19  ;;  %v2670_v5 = vpop.eup %2669 }
 0x4b4   : > { %v1811_v57 = vmul.f32 %v2670_v5, %v1696_v16 }
 0x4b6   : > { %2399 = vmatpush3.xpose.msk.msra.mxu0 %vm902_vm3, %v1825_v56  ;;  %v2672_v9 = vpop.eup %2671 }
 0x4b7   : > { %2400 = vmatprep.subr.msk.mxu0 %vm902_vm3, %v1823_v25  ;;  %v1809_v28 = vmul.f32 %v2672_v9, %v1695_v52  ;;  %v2674_v46 = vpop.eup %2673 }
 0x4b8   : > { %v1807_v18 = vmul.f32 %v2674_v46, %v1694_v20 }
 0x4ba   : > { %2401 = vmatpush3.xpose.msk.msra.mxu0 %vm902_vm3, %v1823_v25 }
 0x4bb   : > { %2402 = vmatprep.subr.msk.mxu0 %vm902_vm3, %v1821_v61 }
 0x4be   : > { %2403 = vmatpush3.xpose.msk.msra.mxu0 %vm902_vm3, %v1821_v61 }
 0x4bf   : > { %2404 = vmatprep.subr.msk.mxu0 %vm902_vm3, %v1819_v8 }
 0x4c2   : > { %2405 = vmatpush3.xpose.msk.msra.mxu0 %vm902_vm3, %v1819_v8 }
 0x4c3   : > { %2406 = vmatprep.subr.msk.mxu0 %vm902_vm3, %v1817_v14 }
 0x4c6   : > { %2407 = vmatpush3.xpose.msk.msra.mxu0 %vm902_vm3, %v1817_v14 }
 0x4c7   : > { %2408 = vmatprep.subr.msk.mxu0 %vm902_vm3, %v1815_v15 }
 0x4ca   : > { %2409 = vmatpush3.xpose.msk.msra.mxu0 %vm902_vm3, %v1815_v15 }
 0x4cb   : > { %2410 = vmatprep.subr.msk.mxu0 %vm902_vm3, %v1813_v4 }
 0x4ce   : > { %2411 = vmatpush3.xpose.msk.msra.mxu0 %vm902_vm3, %v1813_v4 }
 0x4cf   : > { %2412 = vmatprep.subr.msk.mxu0 %vm902_vm3, %v1811_v57 }
 0x4d2   : > { %2413 = vmatpush3.xpose.msk.msra.mxu0 %vm902_vm3, %v1811_v57 }
 0x4d3   : > { %2414 = vmatprep.subr.msk.mxu0 %vm902_vm3, %v1809_v28 }
 0x4d6   : > { %2415 = vmatpush3.xpose.msk.msra.mxu0 %vm902_vm3, %v1809_v28 }
 0x4d7   : > { %2416 = vmatprep.subr.msk.mxu0 %vm902_vm3, %v1807_v18 }
 0x4da   : > { %2417 = vmatpush3.xpose.msk.msra.mxu0 %vm902_vm3, %v1807_v18 }
 0x4dd   : > { %2419 = vmatmul.mubr.msk.f32.vlgmr.msra.gmra.mxu0 %vm902_vm3, %v1839_v26 }
 0x59d   : > { %v2420_v36 = vpop.f32.mrf.mxu0 }
 0x59e   : > { %v1978_v3 = vadd.f32 %v2420_v36, %v1850_v6 }
 0x59f   : > { %v1972_v27 = vpop.f32.mrf.mxu0 }
 0x5a0   : > { %v1984_v41 = vadd.f32 %v1982_v31, %v1978_v3  ;;  %v1973_v55 = vadd.f32 %v1972_v27, %v1845_v7 }
 0x5a2   : > { %1986 = vst [vmem:[%s3008_s17 + $0x8] sm:$0xff] %v1984_v41  ;;  %v1983_v35 = vadd.f32 %v1981_v21, %v1973_v55 }
 0x5a4   : > { %1985 = vst [vmem:[%s3008_s17] sm:$0xff] %v1983_v35 }
 0x5a5 PF: > { %s2246_s13 = sshll.u32 %s2783_s12, 2  ;;  %s2002_s8 = sshll.u32 %s3008_s17, 4  ;;  %s3525_s8 = int_to_ptr.vmem [resolvable:$true] %s2002_s8 }
 0x5a6   : > { %s1999_s6 = sadd.s32 %s2779_s11, %s2246_s13  ;;  %s3643_s14 = sld [smem:[#allocation25_spill]] }
 0x5a7   : > { %s2247_s1 = sshll.u32 %s1999_s6, 7  ;;  %s3645_s10 = sand.u32 1, %s2759_s28  }
 0x5a8   : > { %s3534_s15 = scalar_lea.sflag [#allocation9], %s3645_s10  ;;  %s2675_s21 = scalar_lea.vmem %s3525_s8, 256 }
 0x5a9   : > { %p2676_p10 = scmp.ne.s32.totalorder %s3525_s8, %s2675_s21  ;;  %s2805_s11 = smov [#allocation8]  }
 0x5aa   : > { %s2679_s12 = sshll.u32 %s2805_s11, 4  ;;  %s2680_s12 = int_to_ptr.vmem [resolvable:$false] %s2679_s12 }
 0x5ab   : > { %p2677_p13 = pnand %p2676_p10, %p2947_p11  ;;  %s2681_s17 = scalar_lea.vmem %s2680_s12, 512 }
 0x5ac   : > { %s3644_s24 = smov %s3643_s14  ;;  %s3530_s3 = scalar_lea.hbm %s3643_s14, %s2247_s1 }
 0x5ad   : > { %p2678_p0 = pneg %p2677_p13  ;;  %p2682_p1 = scmp.lt.s32.totalorder %s3525_s8, %s2680_s12 }
 0x5ae   : > { %p2683_p2 = scmp.lt.s32.totalorder %s2681_s17, %s2675_s21 }
 0x5b0   : > { %p2684_p3 = por %p2683_p2, %p2682_p1 }
 0x5b2   : > { %p2685_p4 = pnand %p2684_p3, %p2678_p0 }
 0x5b4   : > { %2688 = shalt.err (!%p2685_p4)
}
 0x5b5   : > { %s2689_s25 = scalar_lea.hbm %s3530_s3, 256  ;;  %s2693_s20 = scalar_lea.hbm %s3644_s24, 1024 }
 0x5b6   : > { %p2690_p5 = scmp.ne.s32.totalorder %s3530_s3, %s2689_s25  ;;  %p2694_p8 = scmp.lt.s32.totalorder %s3530_s3, %s3644_s24 }
 0x5b7   : > { %p2695_p9 = scmp.lt.s32.totalorder %s2693_s20, %s2689_s25 }
 0x5b8   : > { %p2691_p6 = pnand %p2690_p5, %p2947_p11 }
 0x5b9   : > { %p2696_p10 = por %p2695_p9, %p2694_p8 }
 0x5ba   : > { %p2692_p7 = pneg %p2691_p6 }
 0x5bc   : > { %p2697_p13 = pnand %p2696_p10, %p2692_p7 }
 0x5be   : > { %2700 = shalt.err (!%p2697_p13)
}
 0x5bf   : > { %s2806_s6 = smov 128   ;;  %s2807_s1 = smov 256  }
 0x5c0   : > { %s2808_s26 = smov 8  }
 0x5c1   : > { %2439 = dma.vmem_to_hbm [thread:$0]  (%p2947_p11), %s3525_s8, 256, %s3530_s3, %s3534_s15, %s2806_s6, %s2807_s1, %s2808_s26  }
 0x5c2 PF: > { %s3646_s22 = sld [smem:[#allocation11_spill]]  ;;  %p2445_p0 = scmp.ge.s32.totalorder %s2799_s16, 2 }
 0x5c4   : > { %p2442_p1 = pnand %p2445_p0, %p2951_p12 }
 0x5c6   : > { %p2443_p2 = pneg %p2442_p1 }
 0x5c8   : > { %s2017_s10 = sand.u32 1, %s3646_s22  }
 0x5c9   : > { %s2018_s21 = scalar_lea.sflag [#allocation9], %s2017_s10 }
 0x5ca   : > { %2750 = dma.done.wait (%p2443_p2), %s2018_s21, 256  }
 0x5cb   : > { %2752 = vsyncadd (%p2443_p2), %s2018_s21, 4294967040  ;;  %s21_s16 = sadd.s32 1, %s2799_s16   ;;  %s3648_s19 = sld [smem:[#allocation19_spill]] }
 0x5cc   : > { %p18_p3 = scmp.ge.s32.totalorder %s21_s16, 10   ;;  %s3649_s10 = sld [smem:[#allocation12_spill]] }
 0x5cd   : > { %s3650_s11 = sld [smem:[#allocation13_spill]]  ;;  %s3655_s27 = smov %s2759_s28 }
 0x5ce   : > { %s3651_s12 = sld [smem:[#allocation14_spill]]  ;;  %s3656_s28 = smov %s2763_s29 }
 0x5cf   : > { %s3652_s13 = sld [smem:[#allocation15_spill]]  ;;  %s3657_s29 = smov %s2962_s18 }
 0x5d0   : > { %s3653_s14 = sld [smem:[#allocation16_spill]]  ;;  %s3658_s30 = smov %s2771_s9 }
 0x5d1   : > { %s3654_s15 = sld [smem:[#allocation17_spill]]  ;;  %s3659_s9 = smov %s3648_s19 }
 0x5d2   :  { %20 = sbr.rel (!%p18_p3) target bundleno = 14 (0xe), region = 193 }
 0x5d7   :  { %2023 = vsyncpa [#allocation9], 1 }
 0x5d8   :  { %2025 = vsyncpa [#allocation9 + $0x1], 1 }

</bundles_post_ra>
